<compile_context>
chip_gen: v6e
topology: v6e:2x2x1
jax: 0.10.0
libtpu: 0.0.40
codegen_flags: <defaults>
</compile_context>

<pallas_src>
import jax
import jax.numpy as jnp
from jax.experimental import pallas as pl
from jax.experimental.pallas import tpu as pltpu


def _round_up(x: int, m: int) -> int:
    return ((x + m - 1) // m) * m


def _pad2(a, rows: int, cols: int):
    a = a.astype(jnp.float32)
    return jnp.pad(a, ((0, rows - a.shape[0]), (0, cols - a.shape[1])))


def ca0_kernel(xb_ref, xf_ref, wb_ref, bb_ref, wf_ref, bft_ref, out_ref):
    # factor_km[k, m] = sum_d W_factor[k, d] * x_factor[m, d] + b_factor[k]
    # Produced directly in [K, M] layout so the final matmul needs no transpose.
    # Recomputed every step (tiny: K_pad x tile_m x din_f) so both grid axes
    # can be "parallel" (v7x dual-TensorCore sharding).
    fkm = (
        jax.lax.dot_general(
            wf_ref[...], xf_ref[...],
            dimension_numbers=(((1,), (1,)), ((), ())),
            preferred_element_type=jnp.float32,
        )
        + bft_ref[...]
    )

    # beta = x_beta @ W_beta.T + b_beta, expressed without an operand transpose.
    beta = (
        jax.lax.dot_general(
            xb_ref[...], wb_ref[...],
            dimension_numbers=(((1,), (1,)), ((), ())),
            preferred_element_type=jnp.float32,
        )
        + bb_ref[...]
    )

    # out = beta @ factor.T  ==  beta[N,K] @ fkm[K,M]  (plain MXU matmul).
    out_ref[...] = jnp.dot(
        beta, fkm, preferred_element_type=jnp.float32
    ).astype(out_ref.dtype)


def ca0_forward(x_beta, x_factor, w_beta, b_beta, w_factor, b_factor,
                *, tile_n_max=1024, tile_m_max=2048, out_dtype=jnp.float32):
    N, din_b = x_beta.shape
    M, din_f = x_factor.shape
    K = w_beta.shape[0]
    assert w_factor.shape[0] == K, "beta/factor output dims must match"

    # Pad the tiny K dimension up to a sublane multiple; padded weight rows and
    # bias entries are zero, so padded beta cols / fkm rows contribute exactly 0.
    K_pad = max(8, _round_up(K, 8))

    # Tile sizes: N tile multiple of 8, M tile multiple of 128 (lane-dense
    # stores).  ~8 MiB output tiles amortize the ~0.35 us per-grid-step
    # overhead; whole-axis tiles when the axis is small.
    tile_n = min(_round_up(N, 8), tile_n_max)
    tile_m = min(_round_up(M, 128), tile_m_max)
    grid_n = pl.cdiv(N, tile_n)
    grid_m = pl.cdiv(M, tile_m)

    f32 = jnp.float32
    xb = x_beta.astype(f32)                                  # unpadded: Pallas masks partial blocks
    xf = x_factor.astype(f32)
    wb = _pad2(w_beta, K_pad, din_b)
    wf = _pad2(w_factor, K_pad, din_f)
    bb = _pad2(jnp.reshape(b_beta, (1, K)), 1, K_pad)        # [1, K_pad]
    bft = _pad2(jnp.reshape(b_factor, (K, 1)), K_pad, 1)     # [K_pad, 1]

    flops = (2 * N * K_pad * din_b
             + 2 * grid_n * M * K_pad * din_f   # fkm recomputed once per N-tile row
             + 2 * N * M * K_pad)
    bytes_accessed = 4 * (N * din_b + M * din_f
                          + K_pad * din_b + K_pad * din_f + 2 * K_pad
                          + N * M)

    out = pl.pallas_call(
        ca0_kernel,
        out_shape=jax.ShapeDtypeStruct((N, M), out_dtype),
        grid=(grid_n, grid_m),
        in_specs=[
            pl.BlockSpec((tile_n, din_b), lambda i, j: (i, 0)),   # x_beta tile
            pl.BlockSpec((tile_m, din_f), lambda i, j: (j, 0)),   # x_factor tile
            pl.BlockSpec((K_pad, din_b), lambda i, j: (0, 0)),    # W_beta (VMEM-resident)
            pl.BlockSpec((1, K_pad), lambda i, j: (0, 0)),        # b_beta (resident)
            pl.BlockSpec((K_pad, din_f), lambda i, j: (0, 0)),    # W_factor (resident)
            pl.BlockSpec((K_pad, 1), lambda i, j: (0, 0)),        # b_factor^T (resident)
        ],
        out_specs=pl.BlockSpec((tile_n, tile_m), lambda i, j: (i, j)),
        compiler_params=pltpu.CompilerParams(
            dimension_semantics=("parallel", "parallel"),
            vmem_limit_bytes=48 * 1024 * 1024,
        ),
        cost_estimate=pl.CostEstimate(
            flops=flops, transcendentals=0, bytes_accessed=bytes_accessed),
    )(xb, xf, wb, bb, wf, bft)

    return out


if __name__ == "__main__":
    # ParamsIO-style dims: input_dim_beta=32, output_dim_beta=4,
    #                      input_dim_factor=16, output_dim_factor=4
    din_b, din_f, k = 32, 16, 4

    key = jax.random.PRNGKey(0)
    k1, k2, k3, k4, k5 = jax.random.split(key, 5)

    # nn.Linear-convention parameter shapes.
    w_beta = jax.random.normal(k1, (k, din_b), dtype=jnp.float32) * 0.1
    b_beta = jax.random.normal(k2, (1, k), dtype=jnp.float32) * 0.1
    w_factor = jax.random.normal(k3, (k, din_f), dtype=jnp.float32) * 0.1
    b_factor = jax.random.normal(k4, (1, k), dtype=jnp.float32) * 0.1

    def reference(xb, xf):
        beta = xb @ w_beta.T + b_beta
        factor = xf @ w_factor.T + b_factor
        return beta @ factor.T

    # Case 1: single whole-axis tile.  Case 2: ragged shapes -> masked partial
    # block writeback.  Case 3: multi-tile 2x2 grid with ragged last blocks.
    for (n, m) in [(512, 512), (130, 200), (1500, 2200)]:
        kx = jax.random.fold_in(k5, n * 10007 + m)
        kxb, kxf = jax.random.split(kx)
        x_beta = jax.random.normal(kxb, (n, din_b), dtype=jnp.float32)
        x_factor = jax.random.normal(kxf, (m, din_f), dtype=jnp.float32)

        out = ca0_forward(x_beta, x_factor, w_beta, b_beta, w_factor, b_factor)
        out = jax.block_until_ready(out)

        ref = reference(x_beta, x_factor)
        assert out.shape == (n, m)
        assert jnp.allclose(out, ref, atol=1e-4, rtol=1e-4), (n, m)

    print("KERNEL_OK")
</pallas_src>

<mosaic_0001>
module attributes {stable_mosaic.version = 11 : i64} {
  func.func @ca0_kernel(%arg0: i32, %arg1: i32, %arg2: memref<512x32xf32, #tpu.memory_space<vmem>>, %arg3: memref<512x16xf32, #tpu.memory_space<vmem>>, %arg4: memref<8x32xf32, #tpu.memory_space<vmem>>, %arg5: memref<1x8xf32, #tpu.memory_space<vmem>>, %arg6: memref<8x16xf32, #tpu.memory_space<vmem>>, %arg7: memref<8x1xf32, #tpu.memory_space<vmem>>, %arg8: memref<512x512xf32, #tpu.memory_space<vmem>>) attributes {dimension_semantics = [#tpu.dimension_semantics<parallel>, #tpu.dimension_semantics<parallel>], iteration_bounds = array<i64: 1, 1>, scalar_prefetch = 0 : i64, scratch_operands = 0 : i64, tpu.core_type = #tpu.core_type<tc>, window_params = [{transform_indices = @transform_0, window_bounds = array<i64: 512, 32>}, {transform_indices = @transform_1, window_bounds = array<i64: 512, 16>}, {pipeline_mode = #tpu.pipeline_mode<synchronous>, transform_indices = @transform_2, window_bounds = array<i64: 8, 32>}, {pipeline_mode = #tpu.pipeline_mode<synchronous>, transform_indices = @transform_3, window_bounds = array<i64: 1, 8>}, {pipeline_mode = #tpu.pipeline_mode<synchronous>, transform_indices = @transform_4, window_bounds = array<i64: 8, 16>}, {pipeline_mode = #tpu.pipeline_mode<synchronous>, transform_indices = @transform_5, window_bounds = array<i64: 8, 1>}, {transform_indices = @transform_6, window_bounds = array<i64: 512, 512>}]} {
    %c0 = arith.constant 0 : index
    %c0_0 = arith.constant 0 : index
    %0 = vector.load %arg6[%c0, %c0_0] : memref<8x16xf32, #tpu.memory_space<vmem>>, vector<8x16xf32>
    %c0_1 = arith.constant 0 : index
    %c0_2 = arith.constant 0 : index
    %1 = vector.load %arg3[%c0_1, %c0_2] : memref<512x16xf32, #tpu.memory_space<vmem>>, vector<512x16xf32>
    %cst = arith.constant dense<0.000000e+00> : vector<8x512xf32>
    %2 = tpu.matmul %0, %1, %cst {dimension_numbers = #tpu.dot_dimension_numbers<[1], [1], [0], [0], [0, 0, 1, 0], [], []>} : vector<8x16xf32>, vector<512x16xf32>, vector<8x512xf32> -> vector<8x512xf32>
    %c0_3 = arith.constant 0 : index
    %c0_4 = arith.constant 0 : index
    %3 = vector.load %arg7[%c0_3, %c0_4] : memref<8x1xf32, #tpu.memory_space<vmem>>, vector<8x1xf32>
    %4 = vector.broadcast %3 : vector<8x1xf32> to vector<8x512xf32>
    %5 = arith.addf %2, %4 : vector<8x512xf32>
    %c0_5 = arith.constant 0 : index
    %c0_6 = arith.constant 0 : index
    %6 = vector.load %arg2[%c0_5, %c0_6] : memref<512x32xf32, #tpu.memory_space<vmem>>, vector<512x32xf32>
    %c0_7 = arith.constant 0 : index
    %c0_8 = arith.constant 0 : index
    %7 = vector.load %arg4[%c0_7, %c0_8] : memref<8x32xf32, #tpu.memory_space<vmem>>, vector<8x32xf32>
    %cst_9 = arith.constant dense<0.000000e+00> : vector<512x8xf32>
    %8 = tpu.matmul %6, %7, %cst_9 {dimension_numbers = #tpu.dot_dimension_numbers<[1], [1], [0], [0], [0, 0, 1, 0], [], []>} : vector<512x32xf32>, vector<8x32xf32>, vector<512x8xf32> -> vector<512x8xf32>
    %c0_10 = arith.constant 0 : index
    %c0_11 = arith.constant 0 : index
    %9 = vector.load %arg5[%c0_10, %c0_11] : memref<1x8xf32, #tpu.memory_space<vmem>>, vector<1x8xf32>
    %10 = vector.broadcast %9 : vector<1x8xf32> to vector<512x8xf32>
    %11 = arith.addf %8, %10 : vector<512x8xf32>
    %cst_12 = arith.constant dense<0.000000e+00> : vector<512x512xf32>
    %12 = tpu.matmul %11, %5, %cst_12 {dimension_numbers = #tpu.dot_dimension_numbers<[1], [0], [0], [1], [0, 0, 1, 1], [], []>} : vector<512x8xf32>, vector<8x512xf32>, vector<512x512xf32> -> vector<512x512xf32>
    %c0_13 = arith.constant 0 : index
    %c0_14 = arith.constant 0 : index
    %13 = vector.load %arg8[%c0_13, %c0_14] : memref<512x512xf32, #tpu.memory_space<vmem>>, vector<512x512xf32>
    tpu.vector_store %arg8[%c0_13, %c0_14], %12 {strides = array<i32>} : memref<512x512xf32, #tpu.memory_space<vmem>>, vector<512x512xf32>,
    return
  }
  func.func @transform_0(%arg0: i32, %arg1: i32) -> (i32, i32) {
    %c0_i32 = arith.constant 0 : i32
    %c0_i32_0 = arith.constant 0 : i32
    return %arg0, %c0_i32 : i32, i32
  }
  func.func @transform_1(%arg0: i32, %arg1: i32) -> (i32, i32) {
    %c0_i32 = arith.constant 0 : i32
    %c0_i32_0 = arith.constant 0 : i32
    return %arg1, %c0_i32 : i32, i32
  }
  func.func @transform_2(%arg0: i32, %arg1: i32) -> (i32, i32) {
    %c0_i32 = arith.constant 0 : i32
    %c0_i32_0 = arith.constant 0 : i32
    %c0_i32_1 = arith.constant 0 : i32
    return %c0_i32, %c0_i32_0 : i32, i32
  }
  func.func @transform_3(%arg0: i32, %arg1: i32) -> (i32, i32) {
    %c0_i32 = arith.constant 0 : i32
    %c0_i32_0 = arith.constant 0 : i32
    %c0_i32_1 = arith.constant 0 : i32
    return %c0_i32, %c0_i32_0 : i32, i32
  }
  func.func @transform_4(%arg0: i32, %arg1: i32) -> (i32, i32) {
    %c0_i32 = arith.constant 0 : i32
    %c0_i32_0 = arith.constant 0 : i32
    %c0_i32_1 = arith.constant 0 : i32
    return %c0_i32, %c0_i32_0 : i32, i32
  }
  func.func @transform_5(%arg0: i32, %arg1: i32) -> (i32, i32) {
    %c0_i32 = arith.constant 0 : i32
    %c0_i32_0 = arith.constant 0 : i32
    %c0_i32_1 = arith.constant 0 : i32
    return %c0_i32, %c0_i32_0 : i32, i32
  }
  func.func @transform_6(%arg0: i32, %arg1: i32) -> (i32, i32) {
    %c0_i32 = arith.constant 0 : i32
    return %arg0, %arg1 : i32, i32
  }
}

</mosaic_0001>

<bundles_post_ra>
// kernel: tpu_custom_call.1
= control target key start
LH: loop header
LB: loop body
LE: loop exit
PB: predicated region body
PF: predicated region fallthrough
CT: control target
= control target key end

     0   :  { %vm95_vm0 = vcmask 130048   ;;  %v2968_v3 = vmov 0   ;;  %vm505_vm1 = vcmask 261120   ;;  %s4131_s0 = inlined_call_operand.vmem [shape: f32[512,32], index: 0, kind: input, shape index: {}]   ;;  %s4132_s1 = inlined_call_operand.vmem [shape: f32[512,16], index: 1, kind: input, shape index: {}]   ;;  %s4133_s2 = inlined_call_operand.vmem [shape: f32[8,32], index: 2, kind: input, shape index: {}]   ;;  %s4134_s3 = inlined_call_operand.vmem [shape: f32[1,8], index: 3, kind: input, shape index: {}]   ;;  %s4135_s4 = inlined_call_operand.vmem [shape: f32[8,16], index: 4, kind: input, shape index: {}]   ;;  %s4136_s5 = inlined_call_operand.vmem [shape: f32[8,1], index: 5, kind: input, shape index: {}]   ;;  %s4137_s6 = inlined_call_operand.hbm [shape: f32[512,512], index: 6, kind: output, shape index: {}]  }
   0x1   :  { %v56_v0 = vld [vmem:[%s4132_s1 + $0xf8] sm:$0xff]  ;;  %v55_v2 = vld [vmem:[%s4132_s1 + $0xf0] sm:$0xff]  ;;  %2945 = vset.pattern.permute.xlu0 %v2968_v3  ;;  %v54_v5 = vld [vmem:[%s4132_s1 + $0xe8] sm:$0xff] }
   0x2   :  { %v40_v1 = vld [vmem:[%s4132_s1 + $0x78] sm:$0xff]  ;;  %2709 = vmatprep.subr.msk.mxu1 %vm95_vm0, %v56_v0  ;;  %v39_v4 = vld [vmem:[%s4132_s1 + $0x70] sm:$0xff]  ;;  %v38_v6 = vld [vmem:[%s4132_s1 + $0x68] sm:$0xff] }
   0x3   :  { %2710 = vmatpush3.xpose.msk.msra.mxu1 %vm95_vm0, %v40_v1  ;;  %v53_v7 = vld [vmem:[%s4132_s1 + $0xe0] sm:$0xff]  ;;  %v52_v10 = vld [vmem:[%s4132_s1 + $0xd8] sm:$0xff]  ;;  %v51_v12 = vld [vmem:[%s4132_s1 + $0xd0] sm:$0xff] }
   0x4   :  { %2711 = vmatprep.subr.msk.mxu1 %vm95_vm0, %v55_v2  ;;  %v3038_v8 = vld [vmem:[%s4135_s4] sm:$0xff]  ;;  %v36_v11 = vld [vmem:[%s4132_s1 + $0x58] sm:$0xff]  ;;  %v35_v13 = vld [vmem:[%s4132_s1 + $0x50] sm:$0xff] }
   0x5   :  { %v37_v9 = vld [vmem:[%s4132_s1 + $0x60] sm:$0xff]  ;;  %2741 = vmatprep.mubr.msk.f32.mxu1 %vm95_vm0, %v3038_v8  ;;  %v50_v14 = vld [vmem:[%s4132_s1 + $0xc8] sm:$0xff]  ;;  %v435_v21 = vld [vmem:[%s4131_s0 + $0x10] sm:$0xff] }
   0x6   :  { %v89_v15 = vld [vmem:[%s4136_s5] sm:$0xff]  ;;  %v34_v18 = vld [vmem:[%s4132_s1 + $0x48] sm:$0xff]  ;;  %v48_v23 = vld [vmem:[%s4132_s1 + $0xb8] sm:$0xff] }
   0x7   :  { %2712 = vmatpush3.xpose.msk.msra.mxu1 %vm95_vm0, %v39_v4  ;;  %92 = vperm.xlu0 %2945, %v89_v15   ;;  %v497_v16 = vld [vmem:[%s4133_s2] sm:$0xff]  ;;  %v434_v20 = vld [vmem:[%s4131_s0 + $0x8] sm:$0xff]  ;;  %v436_v24 = vld [vmem:[%s4131_s0 + $0x18] sm:$0xff] }
   0x8   :  { %2713 = vmatprep.subr.msk.mxu1 %vm95_vm0, %v54_v5  ;;  %v433_v17 = vld [vmem:[%s4131_s0] sm:$0xff]  ;;  %2842 = vmatprep.subr.msk.mxu0 %vm505_vm1, %v497_v16 }
   0x9   :  { %v49_v19 = vld [vmem:[%s4132_s1 + $0xc0] sm:$0xff]  ;;  %2843 = vmatpush3.xpose.msk.msra.mxu0 %vm505_vm1, %v497_v16  ;;  %2844 = vmatprep.mubr.msk.f32.mxu0 %vm505_vm1, %v433_v17 }
   0xa   :  { %v33_v22 = vld [vmem:[%s4132_s1 + $0x40] sm:$0xff] }
   0xb   :  { %2714 = vmatpush3.xpose.msk.msra.mxu1 %vm95_vm0, %v38_v6  ;;  %v437_v25 = vld [vmem:[%s4131_s0 + $0x20] sm:$0xff] }
   0xc   :  { %2715 = vmatprep.subr.msk.mxu1 %vm95_vm0, %v53_v7  ;;  %2845 = vmatmul.mubr.msk.f32.vlgmr.msra.gmra.mxu0 %vm505_vm1, %v434_v20 }
   0xd   :  { %2847 = vmatprep.mubr.msk.f32.mxu0 %vm505_vm1, %v435_v21 }
   0xf   :  { %2716 = vmatpush3.xpose.msk.msra.mxu1 %vm95_vm0, %v37_v9 }
  0x10   :  { %2717 = vmatprep.subr.msk.mxu1 %vm95_vm0, %v52_v10 }
  0x13   :  { %2718 = vmatpush3.xpose.msk.msra.mxu1 %vm95_vm0, %v36_v11 }
  0x14   :  { %2719 = vmatprep.subr.msk.mxu1 %vm95_vm0, %v51_v12 }
  0x17   :  { %2720 = vmatpush3.xpose.msk.msra.mxu1 %vm95_vm0, %v35_v13 }
  0x18   :  { %2721 = vmatprep.subr.msk.mxu1 %vm95_vm0, %v50_v14 }
  0x1b   :  { %2722 = vmatpush3.xpose.msk.msra.mxu1 %vm95_vm0, %v34_v18 }
  0x1c   :  { %2723 = vmatprep.subr.msk.mxu1 %vm95_vm0, %v49_v19 }
  0x1f   :  { %2724 = vmatpush3.xpose.msk.msra.mxu1 %vm95_vm0, %v33_v22 }
  0x20   :  { %11 = vsyncpa [#allocation3], 0  ;;  %2725 = vmatprep.subr.msk.mxu1 %vm95_vm0, %v48_v23  ;;  %v32_v26 = vld [vmem:[%s4132_s1 + $0x38] sm:$0xff]  ;;  %2848 = vmatmul.mubr.msk.f32.gmra.mxu0 %vm505_vm1, %v436_v24  ;;  %v47_v27 = vld [vmem:[%s4132_s1 + $0xb0] sm:$0xff]  ;;  %vm1086_vm2 = vcmask 64512  }
  0x21   :  { %2850 = vmatprep.mubr.msk.f32.mxu0 %vm505_vm1, %v437_v25  ;;  %v438_v28 = vld [vmem:[%s4131_s0 + $0x28] sm:$0xff]  ;;  %v439_v29 = vld [vmem:[%s4131_s0 + $0x30] sm:$0xff]  ;;  %v440_v32 = vld [vmem:[%s4131_s0 + $0x38] sm:$0xff] }
  0x22   :  { %v31_v30 = vld [vmem:[%s4132_s1 + $0x30] sm:$0xff]  ;;  %v46_v31 = vld [vmem:[%s4132_s1 + $0xa8] sm:$0xff]  ;;  %v441_v33 = vld [vmem:[%s4131_s0 + $0x40] sm:$0xff] }
  0x23   :  { %2726 = vmatpush3.xpose.msk.msra.mxu1 %vm95_vm0, %v32_v26  ;;  %v30_v34 = vld [vmem:[%s4132_s1 + $0x28] sm:$0xff]  ;;  %v45_v35 = vld [vmem:[%s4132_s1 + $0xa0] sm:$0xff]  ;;  %v443_v37 = vld [vmem:[%s4131_s0 + $0x50] sm:$0xff] }
  0x24   :  { %2727 = vmatprep.subr.msk.mxu1 %vm95_vm0, %v47_v27  ;;  %2851 = vmatmul.mubr.msk.f32.gmra.mxu0 %vm505_vm1, %v438_v28  ;;  %v442_v36 = vld [vmem:[%s4131_s0 + $0x48] sm:$0xff]  ;;  %v29_v38 = vld [vmem:[%s4132_s1 + $0x20] sm:$0xff]  ;;  %v44_v39 = vld [vmem:[%s4132_s1 + $0x98] sm:$0xff] }
  0x25   :  { %2853 = vmatprep.mubr.msk.f32.mxu0 %vm505_vm1, %v439_v29  ;;  %v444_v40 = vld [vmem:[%s4131_s0 + $0x58] sm:$0xff]  ;;  %v445_v41 = vld [vmem:[%s4131_s0 + $0x60] sm:$0xff]  ;;  %v43_v43 = vld [vmem:[%s4132_s1 + $0x90] sm:$0xff] }
  0x26   :  { %v28_v42 = vld [vmem:[%s4132_s1 + $0x18] sm:$0xff]  ;;  %v446_v44 = vld [vmem:[%s4131_s0 + $0x68] sm:$0xff]  ;;  %v447_v45 = vld [vmem:[%s4131_s0 + $0x70] sm:$0xff] }
  0x27   :  { %2728 = vmatpush3.xpose.msk.msra.mxu1 %vm95_vm0, %v31_v30  ;;  %v27_v46 = vld [vmem:[%s4132_s1 + $0x10] sm:$0xff]  ;;  %v42_v47 = vld [vmem:[%s4132_s1 + $0x88] sm:$0xff]  ;;  %v448_v48 = vld [vmem:[%s4131_s0 + $0x78] sm:$0xff] }
  0x28   :  { %2729 = vmatprep.subr.msk.mxu1 %vm95_vm0, %v46_v31  ;;  %2854 = vmatmul.mubr.msk.f32.gmra.mxu0 %vm505_vm1, %v440_v32  ;;  %v449_v49 = vld [vmem:[%s4131_s0 + $0x80] sm:$0xff]  ;;  %v26_v50 = vld [vmem:[%s4132_s1 + $0x8] sm:$0xff]  ;;  %v451_v53 = vld [vmem:[%s4131_s0 + $0x90] sm:$0xff] }
  0x29   :  { %2856 = vmatprep.mubr.msk.f32.mxu0 %vm505_vm1, %v441_v33  ;;  %v41_v51 = vld [vmem:[%s4132_s1 + $0x80] sm:$0xff]  ;;  %v450_v52 = vld [vmem:[%s4131_s0 + $0x88] sm:$0xff]  ;;  %v88_v55 = vld [vmem:[%s4132_s1 + $0x1f8] sm:$0xff] }
  0x2a   :  { %v25_v54 = vld [vmem:[%s4132_s1] sm:$0xff]  ;;  %v452_v56 = vld [vmem:[%s4131_s0 + $0x98] sm:$0xff]  ;;  %v87_v59 = vld [vmem:[%s4132_s1 + $0x1f0] sm:$0xff] }
  0x2b   :  { %2730 = vmatpush3.xpose.msk.msra.mxu1 %vm95_vm0, %v30_v34  ;;  %v453_v57 = vld [vmem:[%s4131_s0 + $0xa0] sm:$0xff]  ;;  %v72_v58 = vld [vmem:[%s4132_s1 + $0x178] sm:$0xff]  ;;  %v454_v60 = vld [vmem:[%s4131_s0 + $0xa8] sm:$0xff] }
  0x2c   :  { %2731 = vmatprep.subr.msk.mxu1 %vm95_vm0, %v45_v35  ;;  %2857 = vmatmul.mubr.msk.f32.gmra.mxu0 %vm505_vm1, %v442_v36  ;;  %v455_v61 = vld [vmem:[%s4131_s0 + $0xb0] sm:$0xff]  ;;  %v86_v63 = vld [vmem:[%s4132_s1 + $0x1e8] sm:$0xff]  ;;  %v456_v0 = vld [vmem:[%s4131_s0 + $0xb8] sm:$0xff] }
  0x2d   :  { %2859 = vmatprep.mubr.msk.f32.mxu0 %vm505_vm1, %v443_v37  ;;  %v71_v62 = vld [vmem:[%s4132_s1 + $0x170] sm:$0xff]  ;;  %v457_v1 = vld [vmem:[%s4131_s0 + $0xc0] sm:$0xff]  ;;  %v70_v2 = vld [vmem:[%s4132_s1 + $0x168] sm:$0xff] }
  0x2e   :  { %v85_v3 = vld [vmem:[%s4132_s1 + $0x1e0] sm:$0xff]  ;;  %v458_v4 = vld [vmem:[%s4131_s0 + $0xc8] sm:$0xff]  ;;  %v459_v5 = vld [vmem:[%s4131_s0 + $0xd0] sm:$0xff] }
  0x2f   :  { %2732 = vmatpush3.xpose.msk.msra.mxu1 %vm95_vm0, %v29_v38  ;;  %v69_v6 = vld [vmem:[%s4132_s1 + $0x160] sm:$0xff]  ;;  %v84_v7 = vld [vmem:[%s4132_s1 + $0x1d8] sm:$0xff]  ;;  %v83_v12 = vld [vmem:[%s4132_s1 + $0x1d0] sm:$0xff] }
  0x30   :  { %2733 = vmatprep.subr.msk.mxu1 %vm95_vm0, %v44_v39  ;;  %2860 = vmatmul.mubr.msk.f32.gmra.mxu0 %vm505_vm1, %v444_v40  ;;  %v460_v9 = vld [vmem:[%s4131_s0 + $0xd8] sm:$0xff]  ;;  %v461_v10 = vld [vmem:[%s4131_s0 + $0xe0] sm:$0xff]  ;;  %v462_v13 = vld [vmem:[%s4131_s0 + $0xe8] sm:$0xff] }
  0x31   :  { %2862 = vmatprep.mubr.msk.f32.mxu0 %vm505_vm1, %v445_v41  ;;  %v68_v11 = vld [vmem:[%s4132_s1 + $0x158] sm:$0xff]  ;;  %v463_v14 = vld [vmem:[%s4131_s0 + $0xf0] sm:$0xff]  ;;  %v82_v16 = vld [vmem:[%s4132_s1 + $0x1c8] sm:$0xff] }
  0x32   :  { %v67_v15 = vld [vmem:[%s4132_s1 + $0x150] sm:$0xff]  ;;  %v464_v17 = vld [vmem:[%s4131_s0 + $0xf8] sm:$0xff]  ;;  %v465_v18 = vld [vmem:[%s4131_s0 + $0x100] sm:$0xff] }
  0x33   :  { %2734 = vmatpush3.xpose.msk.msra.mxu1 %vm95_vm0, %v28_v42  ;;  %v66_v19 = vld [vmem:[%s4132_s1 + $0x148] sm:$0xff]  ;;  %v81_v20 = vld [vmem:[%s4132_s1 + $0x1c0] sm:$0xff]  ;;  %v467_v22 = vld [vmem:[%s4131_s0 + $0x110] sm:$0xff] }
  0x34   :  { %2735 = vmatprep.subr.msk.mxu1 %vm95_vm0, %v43_v43  ;;  %2863 = vmatmul.mubr.msk.f32.gmra.mxu0 %vm505_vm1, %v446_v44  ;;  %v466_v21 = vld [vmem:[%s4131_s0 + $0x108] sm:$0xff]  ;;  %v65_v23 = vld [vmem:[%s4132_s1 + $0x140] sm:$0xff]  ;;  %v80_v24 = vld [vmem:[%s4132_s1 + $0x1b8] sm:$0xff] }
  0x35   :  { %2865 = vmatprep.mubr.msk.f32.mxu0 %vm505_vm1, %v447_v45  ;;  %v468_v25 = vld [vmem:[%s4131_s0 + $0x118] sm:$0xff]  ;;  %v469_v26 = vld [vmem:[%s4131_s0 + $0x120] sm:$0xff]  ;;  %v79_v28 = vld [vmem:[%s4132_s1 + $0x1b0] sm:$0xff] }
  0x36   :  { %v64_v27 = vld [vmem:[%s4132_s1 + $0x138] sm:$0xff]  ;;  %v470_v29 = vld [vmem:[%s4131_s0 + $0x128] sm:$0xff]  ;;  %v471_v30 = vld [vmem:[%s4131_s0 + $0x130] sm:$0xff] }
  0x37   :  { %2736 = vmatpush3.xpose.msk.msra.mxu1 %vm95_vm0, %v27_v46  ;;  %v63_v31 = vld [vmem:[%s4132_s1 + $0x130] sm:$0xff]  ;;  %v78_v32 = vld [vmem:[%s4132_s1 + $0x1a8] sm:$0xff]  ;;  %v472_v33 = vld [vmem:[%s4131_s0 + $0x138] sm:$0xff] }
  0x38   :  { %2737 = vmatprep.subr.msk.mxu1 %vm95_vm0, %v42_v47  ;;  %2866 = vmatmul.mubr.msk.f32.gmra.mxu0 %vm505_vm1, %v448_v48  ;;  %v473_v34 = vld [vmem:[%s4131_s0 + $0x140] sm:$0xff]  ;;  %v62_v35 = vld [vmem:[%s4132_s1 + $0x128] sm:$0xff]  ;;  %v475_v38 = vld [vmem:[%s4131_s0 + $0x150] sm:$0xff] }
  0x39   :  { %2868 = vmatprep.mubr.msk.f32.mxu0 %vm505_vm1, %v449_v49  ;;  %v77_v36 = vld [vmem:[%s4132_s1 + $0x1a0] sm:$0xff]  ;;  %v474_v37 = vld [vmem:[%s4131_s0 + $0x148] sm:$0xff]  ;;  %v76_v40 = vld [vmem:[%s4132_s1 + $0x198] sm:$0xff] }
  0x3a   :  { %v61_v39 = vld [vmem:[%s4132_s1 + $0x120] sm:$0xff]  ;;  %v476_v41 = vld [vmem:[%s4131_s0 + $0x158] sm:$0xff]  ;;  %v75_v43 = vld [vmem:[%s4132_s1 + $0x190] sm:$0xff] }
  0x3b   :  { %2738 = vmatpush3.xpose.msk.msra.mxu1 %vm95_vm0, %v26_v50  ;;  %v60_v42 = vld [vmem:[%s4132_s1 + $0x118] sm:$0xff]  ;;  %v477_v44 = vld [vmem:[%s4131_s0 + $0x160] sm:$0xff]  ;;  %v59_v45 = vld [vmem:[%s4132_s1 + $0x110] sm:$0xff] }
  0x3c   :  { %2739 = vmatprep.subr.msk.mxu1 %vm95_vm0, %v41_v51  ;;  %2869 = vmatmul.mubr.msk.f32.gmra.mxu0 %vm505_vm1, %v450_v52  ;;  %v478_v46 = vld [vmem:[%s4131_s0 + $0x168] sm:$0xff]  ;;  %v73_v49 = vld [vmem:[%s4132_s1 + $0x180] sm:$0xff]  ;;  %v479_v50 = vld [vmem:[%s4131_s0 + $0x170] sm:$0xff] }
  0x3d   :  { %2871 = vmatprep.mubr.msk.f32.mxu0 %vm505_vm1, %v451_v53  ;;  %v74_v47 = vld [vmem:[%s4132_s1 + $0x188] sm:$0xff]  ;;  %v57_v51 = vld [vmem:[%s4132_s1 + $0x100] sm:$0xff]  ;;  %v480_v52 = vld [vmem:[%s4131_s0 + $0x178] sm:$0xff] }
  0x3e   :  { %v58_v48 = vld [vmem:[%s4132_s1 + $0x108] sm:$0xff]  ;;  %v481_v53 = vld [vmem:[%s4131_s0 + $0x180] sm:$0xff] }
  0x3f   :  { %2740 = vmatpush3.xpose.msk.msra.mxu1 %vm95_vm0, %v25_v54  ;;  %v482_v54 = vld [vmem:[%s4131_s0 + $0x188] sm:$0xff] }
  0x40   :  { %2743 = vmatprep.subr.msk.mxu1 %vm95_vm0, %v88_v55  ;;  %2872 = vmatmul.mubr.msk.f32.gmra.mxu0 %vm505_vm1, %v452_v56  ;;  %v2969_v55 = vmov 0.0   ;;  %v483_v56 = vld [vmem:[%s4131_s0 + $0x190] sm:$0xff] }
  0x41   :  { %2874 = vmatprep.mubr.msk.f32.mxu0 %vm505_vm1, %v453_v57  ;;  %v485_v57 = vld [vmem:[%s4131_s0 + $0x1a0] sm:$0xff] }
  0x42   :  { %2742 = vmatmul.mubr.msk.f32.vlgmr.msra.gmra.mxu1 %vm95_vm0, %v3038_v8 }
  0x43   :  { %2744 = vmatpush3.xpose.msk.msra.mxu1 %vm95_vm0, %v72_v58  ;;  %2775 = vmatprep.mubr.msk.f32.mxu1 %vm95_vm0, %v3038_v8  ;;  %v486_v58 = vld [vmem:[%s4131_s0 + $0x1a8] sm:$0xff] }
  0x44   :  { %2745 = vmatprep.subr.msk.mxu1 %vm95_vm0, %v87_v59  ;;  %2875 = vmatmul.mubr.msk.f32.gmra.mxu0 %vm505_vm1, %v454_v60  ;;  %v487_v59 = vld [vmem:[%s4131_s0 + $0x1b0] sm:$0xff]  ;;  %v488_v60 = vld [vmem:[%s4131_s0 + $0x1b8] sm:$0xff] }
  0x45   :  { %2877 = vmatprep.mubr.msk.f32.mxu0 %vm505_vm1, %v455_v61  ;;  %v489_v61 = vld [vmem:[%s4131_s0 + $0x1c0] sm:$0xff] }
  0x47   :  { %2746 = vmatpush3.xpose.msk.msra.mxu1 %vm95_vm0, %v71_v62  ;;  %v490_v62 = vld [vmem:[%s4131_s0 + $0x1c8] sm:$0xff] }
  0x48   :  { %2747 = vmatprep.subr.msk.mxu1 %vm95_vm0, %v86_v63  ;;  %2878 = vmatmul.mubr.msk.f32.gmra.mxu0 %vm505_vm1, %v456_v0  ;;  %v491_v63 = vld [vmem:[%s4131_s0 + $0x1d0] sm:$0xff]  ;;  %v492_v0 = vld [vmem:[%s4131_s0 + $0x1d8] sm:$0xff] }
  0x49   :  { %2880 = vmatprep.mubr.msk.f32.mxu0 %vm505_vm1, %v457_v1  ;;  %v493_v1 = vld [vmem:[%s4131_s0 + $0x1e0] sm:$0xff] }
  0x4b   :  { %2748 = vmatpush3.xpose.msk.msra.mxu1 %vm95_vm0, %v70_v2  ;;  %v494_v2 = vld [vmem:[%s4131_s0 + $0x1e8] sm:$0xff] }
  0x4c   :  { %2749 = vmatprep.subr.msk.mxu1 %vm95_vm0, %v85_v3  ;;  %2881 = vmatmul.mubr.msk.f32.gmra.mxu0 %vm505_vm1, %v458_v4  ;;  %v495_v3 = vld [vmem:[%s4131_s0 + $0x1f0] sm:$0xff]  ;;  %v496_v4 = vld [vmem:[%s4131_s0 + $0x1f8] sm:$0xff] }
  0x4d   :  { %2883 = vmatprep.mubr.msk.f32.mxu0 %vm505_vm1, %v459_v5 }
  0x4f   :  { %2750 = vmatpush3.xpose.msk.msra.mxu1 %vm95_vm0, %v69_v6 }
  0x50   :  { %2751 = vmatprep.subr.msk.mxu1 %vm95_vm0, %v84_v7  ;;  %2884 = vmatmul.mubr.msk.f32.gmra.mxu0 %vm505_vm1, %v460_v9  ;;  %v3548_v9 = vld [vmem:[%s4134_s3] ss:$0 sm:$0xff] }
  0x51   :  { %2886 = vmatprep.mubr.msk.f32.mxu0 %vm505_vm1, %v461_v10 }
  0x53   :  { %2752 = vmatpush3.xpose.msk.msra.mxu1 %vm95_vm0, %v68_v11 }
  0x54   :  { %2753 = vmatprep.subr.msk.mxu1 %vm95_vm0, %v83_v12  ;;  %2887 = vmatmul.mubr.msk.f32.gmra.mxu0 %vm505_vm1, %v462_v13 }
  0x55   :  { %2889 = vmatprep.mubr.msk.f32.mxu0 %vm505_vm1, %v463_v14 }
  0x57   :  { %2754 = vmatpush3.xpose.msk.msra.mxu1 %vm95_vm0, %v67_v15 }
  0x58   :  { %2755 = vmatprep.subr.msk.mxu1 %vm95_vm0, %v82_v16  ;;  %2890 = vmatmul.mubr.msk.f32.gmra.mxu0 %vm505_vm1, %v464_v17 }
  0x59   :  { %2892 = vmatprep.mubr.msk.f32.mxu0 %vm505_vm1, %v465_v18 }
  0x5b   :  { %2756 = vmatpush3.xpose.msk.msra.mxu1 %vm95_vm0, %v66_v19 }
  0x5c   :  { %2757 = vmatprep.subr.msk.mxu1 %vm95_vm0, %v81_v20  ;;  %2893 = vmatmul.mubr.msk.f32.gmra.mxu0 %vm505_vm1, %v466_v21 }
  0x5d   :  { %2895 = vmatprep.mubr.msk.f32.mxu0 %vm505_vm1, %v467_v22 }
  0x5f   :  { %2758 = vmatpush3.xpose.msk.msra.mxu1 %vm95_vm0, %v65_v23 }
  0x60   :  { %2759 = vmatprep.subr.msk.mxu1 %vm95_vm0, %v80_v24  ;;  %2896 = vmatmul.mubr.msk.f32.gmra.mxu0 %vm505_vm1, %v468_v25 }
  0x61   :  { %2898 = vmatprep.mubr.msk.f32.mxu0 %vm505_vm1, %v469_v26 }
  0x63   :  { %2760 = vmatpush3.xpose.msk.msra.mxu1 %vm95_vm0, %v64_v27 }
  0x64   :  { %2761 = vmatprep.subr.msk.mxu1 %vm95_vm0, %v79_v28  ;;  %2899 = vmatmul.mubr.msk.f32.gmra.mxu0 %vm505_vm1, %v470_v29 }
  0x65   :  { %2901 = vmatprep.mubr.msk.f32.mxu0 %vm505_vm1, %v471_v30 }
  0x67   :  { %2762 = vmatpush3.xpose.msk.msra.mxu1 %vm95_vm0, %v63_v31 }
  0x68   :  { %2763 = vmatprep.subr.msk.mxu1 %vm95_vm0, %v78_v32  ;;  %2902 = vmatmul.mubr.msk.f32.gmra.mxu0 %vm505_vm1, %v472_v33 }
  0x69   :  { %2904 = vmatprep.mubr.msk.f32.mxu0 %vm505_vm1, %v473_v34 }
  0x6b   :  { %2764 = vmatpush3.xpose.msk.msra.mxu1 %vm95_vm0, %v62_v35 }
  0x6c   :  { %2765 = vmatprep.subr.msk.mxu1 %vm95_vm0, %v77_v36  ;;  %2905 = vmatmul.mubr.msk.f32.gmra.mxu0 %vm505_vm1, %v474_v37 }
  0x6d   :  { %2907 = vmatprep.mubr.msk.f32.mxu0 %vm505_vm1, %v475_v38 }
  0x6f   :  { %2766 = vmatpush3.xpose.msk.msra.mxu1 %vm95_vm0, %v61_v39 }
  0x70   :  { %2767 = vmatprep.subr.msk.mxu1 %vm95_vm0, %v76_v40  ;;  %2908 = vmatmul.mubr.msk.f32.gmra.mxu0 %vm505_vm1, %v476_v41 }
  0x71   :  { %2910 = vmatprep.mubr.msk.f32.mxu0 %vm505_vm1, %v477_v44 }
  0x73   :  { %2768 = vmatpush3.xpose.msk.msra.mxu1 %vm95_vm0, %v60_v42 }
  0x74   :  { %2769 = vmatprep.subr.msk.mxu1 %vm95_vm0, %v75_v43  ;;  %2911 = vmatmul.mubr.msk.f32.gmra.mxu0 %vm505_vm1, %v478_v46 }
  0x75   :  { %2913 = vmatprep.mubr.msk.f32.mxu0 %vm505_vm1, %v479_v50 }
  0x77   :  { %2770 = vmatpush3.xpose.msk.msra.mxu1 %vm95_vm0, %v59_v45 }
  0x78   :  { %2771 = vmatprep.subr.msk.mxu1 %vm95_vm0, %v74_v47  ;;  %2914 = vmatmul.mubr.msk.f32.gmra.mxu0 %vm505_vm1, %v480_v52 }
  0x79   :  { %2916 = vmatprep.mubr.msk.f32.mxu0 %vm505_vm1, %v481_v53 }
  0x7b   :  { %2772 = vmatpush3.xpose.msk.msra.mxu1 %vm95_vm0, %v58_v48 }
  0x7c   :  { %2773 = vmatprep.subr.msk.mxu1 %vm95_vm0, %v73_v49  ;;  %2917 = vmatmul.mubr.msk.f32.gmra.mxu0 %vm505_vm1, %v482_v54 }
  0x7d   :  { %2919 = vmatprep.mubr.msk.f32.mxu0 %vm505_vm1, %v483_v56 }
  0x7f   :  { %2774 = vmatpush3.xpose.msk.msra.mxu1 %vm95_vm0, %v57_v51 }
  0x82   :  { %2776 = vmatmul.mubr.msk.f32.vlgmr.msra.gmra.mxu1 %vm95_vm0, %v3038_v8  ;;  %v484_v8 = vld [vmem:[%s4131_s0 + $0x198] sm:$0xff]  ;;  %v3543_v6 = vpop.permute.xlu0 %92  ;;  %s2970_s0 = smov [#allocation2]  }
  0x83   :  { %1343 = vmatprep.mubr.f32.mxu1 %v2969_v55  ;;  %2920 = vmatmul.mubr.msk.f32.gmra.mxu0 %vm505_vm1, %v484_v8  ;;  %s2438_s3 = sshll.u32 %s2970_s0, 4  ;;  %s2439_s3 = int_to_ptr.vmem [resolvable:$true] %s2438_s3 }
  0x84   :  { %2922 = vmatprep.mubr.msk.f32.mxu0 %vm505_vm1, %v485_v57  ;;  %s2946_s16 = scalar_lea.vmem %s2439_s3, 32768  ;;  %p2951_p1 = scmp.lt.s32.totalorder %s2439_s3, %s2439_s3 }
  0x85   :  { %p2947_p0 = scmp.ne.s32.totalorder %s2439_s3, %s2946_s16  ;;  %p2952_p2 = scmp.lt.s32.totalorder %s2946_s16, %s2946_s16 }
  0x87   :  { %2923 = vmatmul.mubr.msk.f32.gmra.mxu0 %vm505_vm1, %v486_v58  ;;  %p2953_p3 = por %p2952_p2, %p2951_p1 }
  0x88   :  { %2925 = vmatprep.mubr.msk.f32.mxu0 %vm505_vm1, %v487_v59 }
  0x89   :  { %p2954_p4 = pnand %p2953_p3, %p2947_p0 }
  0x8b   :  { %2926 = vmatmul.mubr.msk.f32.gmra.mxu0 %vm505_vm1, %v488_v60 }
  0x8c   :  { %2928 = vmatprep.mubr.msk.f32.mxu0 %vm505_vm1, %v489_v61 }
  0x8f   :  { %2929 = vmatmul.mubr.msk.f32.gmra.mxu0 %vm505_vm1, %v490_v62 }
  0x90   :  { %2931 = vmatprep.mubr.msk.f32.mxu0 %vm505_vm1, %v491_v63 }
  0x93   :  { %2932 = vmatmul.mubr.msk.f32.gmra.mxu0 %vm505_vm1, %v492_v0 }
  0x94   :  { %2934 = vmatprep.mubr.msk.f32.mxu0 %vm505_vm1, %v493_v1 }
  0x97   :  { %2935 = vmatmul.mubr.msk.f32.gmra.mxu0 %vm505_vm1, %v494_v2 }
  0x98   :  { %2937 = vmatprep.mubr.msk.f32.mxu0 %vm505_vm1, %v495_v3 }
  0x9b   :  { %2938 = vmatmul.mubr.msk.f32.gmra.mxu0 %vm505_vm1, %v496_v4 }
  0x9c   :  { %1792 = vmatprep.mubr.f32.mxu0 %v2969_v55 }
  0xcc   :  { %v2846_v5 = vpop.f32.mrf.mxu0 }
  0xcd   :  { %v3556_v16 = vadd.f32 %v2846_v5, %v3548_v9 }
  0xce   :  { %v767_v10 = vpop.f32.mrf.mxu0 }
  0xcf   :  { %v3552_v13 = vadd.f32 %v3548_v9, %v767_v10 }
  0xe0   :  { %v2849_v15 = vpop.f32.mrf.mxu0 }
  0xe1   :  { %v3568_v20 = vadd.f32 %v2849_v15, %v3548_v9 }
  0xe2   :  { %v777_v17 = vpop.f32.mrf.mxu0 }
  0xe3   :  { %v3564_v18 = vadd.f32 %v3548_v9, %v777_v17 }
  0xe4   :  { %v2852_v19 = vpop.f32.mrf.mxu0 }
  0xe5   :  { %v3580_v24 = vadd.f32 %v2852_v19, %v3548_v9 }
  0xe6   :  { %v787_v21 = vpop.f32.mrf.mxu0 }
  0xe7   :  { %v3576_v22 = vadd.f32 %v3548_v9, %v787_v21 }
  0xe8   :  { %v2855_v23 = vpop.f32.mrf.mxu0 }
  0xe9   :  { %v3592_v28 = vadd.f32 %v2855_v23, %v3548_v9 }
  0xea   :  { %v797_v25 = vpop.f32.mrf.mxu0 }
  0xeb   :  { %v3588_v26 = vadd.f32 %v3548_v9, %v797_v25 }
  0xec   :  { %v2858_v27 = vpop.f32.mrf.mxu0 }
  0xed   :  { %v3604_v32 = vadd.f32 %v2858_v27, %v3548_v9 }
  0xee   :  { %v807_v29 = vpop.f32.mrf.mxu0 }
  0xef   :  { %v3600_v30 = vadd.f32 %v3548_v9, %v807_v29 }
  0xf0   :  { %v2861_v31 = vpop.f32.mrf.mxu0 }
  0xf1   :  { %v3616_v36 = vadd.f32 %v2861_v31, %v3548_v9 }
  0xf2   :  { %v817_v33 = vpop.f32.mrf.mxu0 }
  0xf3   :  { %v3612_v34 = vadd.f32 %v3548_v9, %v817_v33 }
  0xf4   :  { %v2864_v35 = vpop.f32.mrf.mxu0 }
  0xf5   :  { %v3628_v40 = vadd.f32 %v2864_v35, %v3548_v9 }
  0xf6   :  { %v827_v37 = vpop.f32.mrf.mxu0 }
  0xf7   :  { %v3624_v38 = vadd.f32 %v3548_v9, %v827_v37 }
  0xf8   :  { %v2867_v39 = vpop.f32.mrf.mxu0 }
  0xf9   :  { %v3640_v44 = vadd.f32 %v2867_v39, %v3548_v9 }
  0xfa   :  { %v837_v41 = vpop.f32.mrf.mxu0 }
  0xfb   :  { %v3636_v42 = vadd.f32 %v3548_v9, %v837_v41 }
  0xfc   :  { %v2870_v43 = vpop.f32.mrf.mxu0 }
  0xfd   :  { %v3656_v52 = vadd.f32 %v2870_v43, %v3548_v9 }
  0xfe   :  { %v847_v46 = vpop.f32.mrf.mxu0 }
  0xff   :  { %v3649_v49 = vadd.f32 %v3548_v9, %v847_v46 }
 0x100   :  { %v2873_v51 = vpop.f32.mrf.mxu0 }
 0x101   :  { %v3674_v8 = vadd.f32 %v2873_v51, %v3548_v9 }
 0x102   :  { %v357_v7 = vpop.f32.mrf.mxu1  ;;  %v857_v53 = vpop.f32.mrf.mxu0 }
 0x103   :  { %v358_v14 = vadd.f32 %v357_v7, %v3543_v6  ;;  %v3667_v54 = vadd.f32 %v3548_v9, %v857_v53 }
 0x104   :  { %v359_v11 = vpop.f32.mrf.mxu1  ;;  %v2876_v56 = vpop.f32.mrf.mxu0 }
 0x105   :  { %v360_v12 = vadd.f32 %v359_v11, %v3543_v6  ;;  %v3692_v60 = vadd.f32 %v2876_v56, %v3548_v9 }
 0x106   :  { %v867_v57 = vpop.f32.mrf.mxu0 }
 0x107   :  { %1309 = vmatprep.subr.mxu1 %v360_v12  ;;  %v3685_v58 = vadd.f32 %v3548_v9, %v867_v57 }
 0x108   :  { %1310 = vmatpush1.msra.mxu1 %v358_v14  ;;  %v2879_v59 = vpop.f32.mrf.mxu0 }
 0x109   :  { %2581 = vmatmul.mubr.msk.f32.vlgmr.msra.gmra.mxu1 %vm1086_vm2, %v3552_v13  ;;  %v3710_v0 = vadd.f32 %v2879_v59, %v3548_v9 }
 0x10a   :  { %1349 = vmatprep.mubr.f32.mxu1 %v2969_v55  ;;  %v877_v61 = vpop.f32.mrf.mxu0 }
 0x10b   :  { %v3703_v62 = vadd.f32 %v3548_v9, %v877_v61 }
 0x10c   :  { %v2882_v63 = vpop.f32.mrf.mxu0 }
 0x10d   :  { %2582 = vmatmul.mubr.msk.f32.gmra.mxu1 %vm1086_vm2, %v3556_v16  ;;  %v3728_v4 = vadd.f32 %v2882_v63, %v3548_v9 }
 0x10e   :  { %1355 = vmatprep.mubr.f32.mxu1 %v2969_v55  ;;  %v887_v1 = vpop.f32.mrf.mxu0 }
 0x10f   :  { %v3721_v2 = vadd.f32 %v3548_v9, %v887_v1 }
 0x110   :  { %v2885_v3 = vpop.f32.mrf.mxu0 }
 0x111   :  { %2583 = vmatmul.mubr.msk.f32.gmra.mxu1 %vm1086_vm2, %v3564_v18  ;;  %v3746_v10 = vadd.f32 %v2885_v3, %v3548_v9 }
 0x112   :  { %1361 = vmatprep.mubr.f32.mxu1 %v2969_v55  ;;  %v897_v5 = vpop.f32.mrf.mxu0 }
 0x114   :  { %v2888_v7 = vpop.f32.mrf.mxu0 }
 0x115   :  { %2584 = vmatmul.mubr.msk.f32.gmra.mxu1 %vm1086_vm2, %v3568_v20  ;;  %v3764_v14 = vadd.f32 %v2888_v7, %v3548_v9 }
 0x116   :  { %1367 = vmatprep.mubr.f32.mxu1 %v2969_v55  ;;  %v907_v11 = vpop.f32.mrf.mxu0 }
 0x117   :  { %v3757_v12 = vadd.f32 %v3548_v9, %v907_v11 }
 0x119   :  { %2585 = vmatmul.mubr.msk.f32.gmra.mxu1 %vm1086_vm2, %v3576_v22 }
 0x11a   :  { %1373 = vmatprep.mubr.f32.mxu1 %v2969_v55 }
 0x11d   :  { %2586 = vmatmul.mubr.msk.f32.gmra.mxu1 %vm1086_vm2, %v3580_v24 }
 0x11e   :  { %1379 = vmatprep.mubr.f32.mxu1 %v2969_v55 }
 0x121   :  { %2587 = vmatmul.mubr.msk.f32.gmra.mxu1 %vm1086_vm2, %v3588_v26 }
 0x122   :  { %1385 = vmatprep.mubr.f32.mxu1 %v2969_v55 }
 0x125   :  { %2588 = vmatmul.mubr.msk.f32.gmra.mxu1 %vm1086_vm2, %v3592_v28 }
 0x126   :  { %1391 = vmatprep.mubr.f32.mxu1 %v2969_v55 }
 0x129   :  { %2589 = vmatmul.mubr.msk.f32.gmra.mxu1 %vm1086_vm2, %v3600_v30 }
 0x12a   :  { %1397 = vmatprep.mubr.f32.mxu1 %v2969_v55 }
 0x12d   :  { %2590 = vmatmul.mubr.msk.f32.gmra.mxu1 %vm1086_vm2, %v3604_v32 }
 0x12e   :  { %1403 = vmatprep.mubr.f32.mxu1 %v2969_v55 }
 0x131   :  { %2591 = vmatmul.mubr.msk.f32.gmra.mxu1 %vm1086_vm2, %v3612_v34 }
 0x132   :  { %1409 = vmatprep.mubr.f32.mxu1 %v2969_v55 }
 0x135   :  { %2592 = vmatmul.mubr.msk.f32.gmra.mxu1 %vm1086_vm2, %v3616_v36 }
 0x136   :  { %1415 = vmatprep.mubr.f32.mxu1 %v2969_v55 }
 0x139   :  { %2593 = vmatmul.mubr.msk.f32.gmra.mxu1 %vm1086_vm2, %v3624_v38 }
 0x13a   :  { %1421 = vmatprep.mubr.f32.mxu1 %v2969_v55 }
 0x13d   :  { %2594 = vmatmul.mubr.msk.f32.gmra.mxu1 %vm1086_vm2, %v3628_v40 }
 0x13e   :  { %1427 = vmatprep.mubr.f32.mxu1 %v2969_v55 }
 0x141   :  { %2595 = vmatmul.mubr.msk.f32.gmra.mxu1 %vm1086_vm2, %v3636_v42 }
 0x142   :  { %v428_v45 = vpop.f32.mrf.mxu1  ;;  %1433 = vmatprep.mubr.f32.mxu1 %v2969_v55 }
 0x143   :  { %v429_v50 = vadd.f32 %v428_v45, %v3543_v6 }
 0x144   :  { %v430_v47 = vpop.f32.mrf.mxu1 }
 0x145   :  { %v431_v48 = vadd.f32 %v430_v47, %v3543_v6  ;;  %2596 = vmatmul.mubr.msk.f32.gmra.mxu1 %vm1086_vm2, %v3640_v44  ;;  %v3739_v6 = vadd.f32 %v3548_v9, %v897_v5 }
 0x146   :  { %1439 = vmatprep.mubr.f32.mxu1 %v2969_v55 }
 0x147   :  { %1758 = vmatprep.subr.mxu0 %v431_v48 }
 0x148   :  { %1759 = vmatpush1.msra.mxu0 %v429_v50 }
 0x149   :  { %2645 = vmatmul.mubr.msk.f32.vlgmr.msra.gmra.mxu0 %vm1086_vm2, %v3552_v13  ;;  %2597 = vmatmul.mubr.msk.f32.gmra.mxu1 %vm1086_vm2, %v3649_v49  ;;  %v2891_v13 = vpop.f32.mrf.mxu0 }
 0x14a   :  { %1798 = vmatprep.mubr.f32.mxu0 %v2969_v55  ;;  %1445 = vmatprep.mubr.f32.mxu1 %v2969_v55 }
 0x14b   :  { %v917_v15 = vpop.f32.mrf.mxu0 }
 0x14d   :  { %2646 = vmatmul.mubr.msk.f32.gmra.mxu0 %vm1086_vm2, %v3556_v16  ;;  %2598 = vmatmul.mubr.msk.f32.gmra.mxu1 %vm1086_vm2, %v3656_v52  ;;  %v3775_v16 = vadd.f32 %v3548_v9, %v917_v15  ;;  %v2894_v17 = vpop.f32.mrf.mxu0 }
 0x14e   :  { %1804 = vmatprep.mubr.f32.mxu0 %v2969_v55  ;;  %1451 = vmatprep.mubr.f32.mxu1 %v2969_v55 }
 0x14f   :  { %v927_v19 = vpop.f32.mrf.mxu0 }
 0x151   :  { %2647 = vmatmul.mubr.msk.f32.gmra.mxu0 %vm1086_vm2, %v3564_v18  ;;  %2599 = vmatmul.mubr.msk.f32.gmra.mxu1 %vm1086_vm2, %v3667_v54  ;;  %v3782_v18 = vadd.f32 %v2891_v13, %v3548_v9  ;;  %v2897_v21 = vpop.f32.mrf.mxu0 }
 0x152   :  { %1810 = vmatprep.mubr.f32.mxu0 %v2969_v55  ;;  %1457 = vmatprep.mubr.f32.mxu1 %v2969_v55 }
 0x153   :  { %v937_v23 = vpop.f32.mrf.mxu0 }
 0x155   :  { %2648 = vmatmul.mubr.msk.f32.gmra.mxu0 %vm1086_vm2, %v3568_v20  ;;  %2600 = vmatmul.mubr.msk.f32.gmra.mxu1 %vm1086_vm2, %v3674_v8  ;;  %v3793_v20 = vadd.f32 %v3548_v9, %v927_v19  ;;  %v2900_v25 = vpop.f32.mrf.mxu0 }
 0x156   :  { %1816 = vmatprep.mubr.f32.mxu0 %v2969_v55  ;;  %1463 = vmatprep.mubr.f32.mxu1 %v2969_v55 }
 0x157   :  { %v947_v27 = vpop.f32.mrf.mxu0 }
 0x159   :  { %2649 = vmatmul.mubr.msk.f32.gmra.mxu0 %vm1086_vm2, %v3576_v22  ;;  %2601 = vmatmul.mubr.msk.f32.gmra.mxu1 %vm1086_vm2, %v3685_v58  ;;  %v3800_v22 = vadd.f32 %v2894_v17, %v3548_v9  ;;  %v2903_v29 = vpop.f32.mrf.mxu0 }
 0x15a   :  { %1822 = vmatprep.mubr.f32.mxu0 %v2969_v55  ;;  %1469 = vmatprep.mubr.f32.mxu1 %v2969_v55 }
 0x15b   :  { %v957_v31 = vpop.f32.mrf.mxu0 }
 0x15d   :  { %2650 = vmatmul.mubr.msk.f32.gmra.mxu0 %vm1086_vm2, %v3580_v24  ;;  %2602 = vmatmul.mubr.msk.f32.gmra.mxu1 %vm1086_vm2, %v3692_v60  ;;  %v3811_v24 = vadd.f32 %v3548_v9, %v937_v23  ;;  %v2906_v33 = vpop.f32.mrf.mxu0 }
 0x15e   :  { %1828 = vmatprep.mubr.f32.mxu0 %v2969_v55  ;;  %1475 = vmatprep.mubr.f32.mxu1 %v2969_v55 }
 0x15f   :  { %v967_v35 = vpop.f32.mrf.mxu0 }
 0x161   :  { %2651 = vmatmul.mubr.msk.f32.gmra.mxu0 %vm1086_vm2, %v3588_v26  ;;  %2603 = vmatmul.mubr.msk.f32.gmra.mxu1 %vm1086_vm2, %v3703_v62  ;;  %v3818_v26 = vadd.f32 %v2897_v21, %v3548_v9  ;;  %v2909_v37 = vpop.f32.mrf.mxu0 }
 0x162   :  { %1834 = vmatprep.mubr.f32.mxu0 %v2969_v55  ;;  %1481 = vmatprep.mubr.f32.mxu1 %v2969_v55 }
 0x163   :  { %v977_v39 = vpop.f32.mrf.mxu0 }
 0x165   :  { %2652 = vmatmul.mubr.msk.f32.gmra.mxu0 %vm1086_vm2, %v3592_v28  ;;  %2604 = vmatmul.mubr.msk.f32.gmra.mxu1 %vm1086_vm2, %v3710_v0  ;;  %v3827_v28 = vadd.f32 %v3548_v9, %v947_v27  ;;  %v2912_v41 = vpop.f32.mrf.mxu0 }
 0x166   :  { %1840 = vmatprep.mubr.f32.mxu0 %v2969_v55  ;;  %1487 = vmatprep.mubr.f32.mxu1 %v2969_v55  ;;  %v3908_v46 = vadd.f32 %v2912_v41, %v3548_v9 }
 0x167   :  { %v987_v43 = vpop.f32.mrf.mxu0 }
 0x169   :  { %2653 = vmatmul.mubr.msk.f32.gmra.mxu0 %vm1086_vm2, %v3600_v30  ;;  %2605 = vmatmul.mubr.msk.f32.gmra.mxu1 %vm1086_vm2, %v3721_v2  ;;  %v3836_v30 = vadd.f32 %v2900_v25, %v3548_v9  ;;  %v2915_v45 = vpop.f32.mrf.mxu0 }
 0x16a   :  { %1846 = vmatprep.mubr.f32.mxu0 %v2969_v55  ;;  %1493 = vmatprep.mubr.f32.mxu1 %v2969_v55  ;;  %v3926_v50 = vadd.f32 %v2915_v45, %v3548_v9 }
 0x16b   :  { %v997_v47 = vpop.f32.mrf.mxu0 }
 0x16c   :  { %v3917_v48 = vadd.f32 %v3548_v9, %v997_v47 }
 0x16d   :  { %2654 = vmatmul.mubr.msk.f32.gmra.mxu0 %vm1086_vm2, %v3604_v32  ;;  %2606 = vmatmul.mubr.msk.f32.gmra.mxu1 %vm1086_vm2, %v3728_v4  ;;  %v3845_v32 = vadd.f32 %v3548_v9, %v957_v31 }
 0x16e   :  { %1852 = vmatprep.mubr.f32.mxu0 %v2969_v55  ;;  %1499 = vmatprep.mubr.f32.mxu1 %v2969_v55 }
 0x171   :  { %2655 = vmatmul.mubr.msk.f32.gmra.mxu0 %vm1086_vm2, %v3612_v34  ;;  %2607 = vmatmul.mubr.msk.f32.gmra.mxu1 %vm1086_vm2, %v3739_v6  ;;  %v3854_v34 = vadd.f32 %v2903_v29, %v3548_v9 }
 0x172   :  { %1858 = vmatprep.mubr.f32.mxu0 %v2969_v55  ;;  %1505 = vmatprep.mubr.f32.mxu1 %v2969_v55 }
 0x175   :  { %2656 = vmatmul.mubr.msk.f32.gmra.mxu0 %vm1086_vm2, %v3616_v36  ;;  %2608 = vmatmul.mubr.msk.f32.gmra.mxu1 %vm1086_vm2, %v3746_v10  ;;  %v3863_v36 = vadd.f32 %v3548_v9, %v967_v35 }
 0x176   :  { %1864 = vmatprep.mubr.f32.mxu0 %v2969_v55  ;;  %1511 = vmatprep.mubr.f32.mxu1 %v2969_v55 }
 0x179   :  { %2657 = vmatmul.mubr.msk.f32.gmra.mxu0 %vm1086_vm2, %v3624_v38  ;;  %2609 = vmatmul.mubr.msk.f32.gmra.mxu1 %vm1086_vm2, %v3757_v12  ;;  %v3872_v38 = vadd.f32 %v2906_v33, %v3548_v9 }
 0x17a   :  { %1870 = vmatprep.mubr.f32.mxu0 %v2969_v55  ;;  %1517 = vmatprep.mubr.f32.mxu1 %v2969_v55 }
 0x17d   :  { %2658 = vmatmul.mubr.msk.f32.gmra.mxu0 %vm1086_vm2, %v3628_v40  ;;  %2610 = vmatmul.mubr.msk.f32.gmra.mxu1 %vm1086_vm2, %v3764_v14  ;;  %v3881_v40 = vadd.f32 %v3548_v9, %v977_v39 }
 0x17e   :  { %1876 = vmatprep.mubr.f32.mxu0 %v2969_v55  ;;  %1523 = vmatprep.mubr.f32.mxu1 %v2969_v55 }
 0x181   :  { %2659 = vmatmul.mubr.msk.f32.gmra.mxu0 %vm1086_vm2, %v3636_v42  ;;  %2611 = vmatmul.mubr.msk.f32.gmra.mxu1 %vm1086_vm2, %v3775_v16  ;;  %v3890_v42 = vadd.f32 %v2909_v37, %v3548_v9 }
 0x182   :  { %1882 = vmatprep.mubr.f32.mxu0 %v2969_v55  ;;  %1529 = vmatprep.mubr.f32.mxu1 %v2969_v55 }
 0x185   :  { %2660 = vmatmul.mubr.msk.f32.gmra.mxu0 %vm1086_vm2, %v3640_v44  ;;  %2612 = vmatmul.mubr.msk.f32.gmra.mxu1 %vm1086_vm2, %v3782_v18  ;;  %v3899_v44 = vadd.f32 %v3548_v9, %v987_v43 }
 0x186   :  { %1888 = vmatprep.mubr.f32.mxu0 %v2969_v55  ;;  %1535 = vmatprep.mubr.f32.mxu1 %v2969_v55 }
 0x189   :  { %2661 = vmatmul.mubr.msk.f32.gmra.mxu0 %vm1086_vm2, %v3649_v49  ;;  %2613 = vmatmul.mubr.msk.f32.gmra.mxu1 %vm1086_vm2, %v3793_v20  ;;  %v2918_v49 = vpop.f32.mrf.mxu0 }
 0x18a   :  { %1894 = vmatprep.mubr.f32.mxu0 %v2969_v55  ;;  %1541 = vmatprep.mubr.f32.mxu1 %v2969_v55 }
 0x18b   :  { %v1007_v51 = vpop.f32.mrf.mxu0 }
 0x18d   :  { %2662 = vmatmul.mubr.msk.f32.gmra.mxu0 %vm1086_vm2, %v3656_v52  ;;  %2614 = vmatmul.mubr.msk.f32.gmra.mxu1 %vm1086_vm2, %v3800_v22  ;;  %v3935_v52 = vadd.f32 %v3548_v9, %v1007_v51  ;;  %v2921_v53 = vpop.f32.mrf.mxu0 }
 0x18e   :  { %1900 = vmatprep.mubr.f32.mxu0 %v2969_v55  ;;  %1547 = vmatprep.mubr.f32.mxu1 %v2969_v55 }
 0x191   :  { %2663 = vmatmul.mubr.msk.f32.gmra.mxu0 %vm1086_vm2, %v3667_v54  ;;  %2615 = vmatmul.mubr.msk.f32.gmra.mxu1 %vm1086_vm2, %v3811_v24  ;;  %v3944_v54 = vadd.f32 %v2918_v49, %v3548_v9 }
 0x192   :  { %1906 = vmatprep.mubr.f32.mxu0 %v2969_v55  ;;  %1553 = vmatprep.mubr.f32.mxu1 %v2969_v55 }
 0x195   :  { %2664 = vmatmul.mubr.msk.f32.gmra.mxu0 %vm1086_vm2, %v3674_v8  ;;  %2616 = vmatmul.mubr.msk.f32.gmra.mxu1 %vm1086_vm2, %v3818_v26  ;;  %v1017_v8 = vpop.f32.mrf.mxu0 }
 0x196   :  { %1912 = vmatprep.mubr.f32.mxu0 %v2969_v55  ;;  %1559 = vmatprep.mubr.f32.mxu1 %v2969_v55 }
 0x199   :  { %2665 = vmatmul.mubr.msk.f32.gmra.mxu0 %vm1086_vm2, %v3685_v58  ;;  %2617 = vmatmul.mubr.msk.f32.gmra.mxu1 %vm1086_vm2, %v3827_v28  ;;  %v3953_v58 = vadd.f32 %v3548_v9, %v1017_v8 }
 0x19a   :  { %1918 = vmatprep.mubr.f32.mxu0 %v2969_v55  ;;  %1565 = vmatprep.mubr.f32.mxu1 %v2969_v55 }
 0x19d   :  { %2666 = vmatmul.mubr.msk.f32.gmra.mxu0 %vm1086_vm2, %v3692_v60  ;;  %2618 = vmatmul.mubr.msk.f32.gmra.mxu1 %vm1086_vm2, %v3836_v30  ;;  %v2924_v60 = vpop.f32.mrf.mxu0 }
 0x19e   :  { %1924 = vmatprep.mubr.f32.mxu0 %v2969_v55  ;;  %1571 = vmatprep.mubr.f32.mxu1 %v2969_v55 }
 0x1a1   :  { %2667 = vmatmul.mubr.msk.f32.gmra.mxu0 %vm1086_vm2, %v3703_v62  ;;  %2619 = vmatmul.mubr.msk.f32.gmra.mxu1 %vm1086_vm2, %v3845_v32  ;;  %v3962_v62 = vadd.f32 %v2921_v53, %v3548_v9 }
 0x1a2   :  { %1930 = vmatprep.mubr.f32.mxu0 %v2969_v55  ;;  %1577 = vmatprep.mubr.f32.mxu1 %v2969_v55 }
 0x1a5   :  { %2668 = vmatmul.mubr.msk.f32.gmra.mxu0 %vm1086_vm2, %v3710_v0  ;;  %2620 = vmatmul.mubr.msk.f32.gmra.mxu1 %vm1086_vm2, %v3854_v34  ;;  %v1027_v0 = vpop.f32.mrf.mxu0 }
 0x1a6   :  { %1936 = vmatprep.mubr.f32.mxu0 %v2969_v55  ;;  %1583 = vmatprep.mubr.f32.mxu1 %v2969_v55 }
 0x1a9   :  { %2669 = vmatmul.mubr.msk.f32.gmra.mxu0 %vm1086_vm2, %v3721_v2  ;;  %2621 = vmatmul.mubr.msk.f32.gmra.mxu1 %vm1086_vm2, %v3863_v36  ;;  %v3971_v2 = vadd.f32 %v3548_v9, %v1027_v0 }
 0x1aa   :  { %1942 = vmatprep.mubr.f32.mxu0 %v2969_v55  ;;  %1589 = vmatprep.mubr.f32.mxu1 %v2969_v55 }
 0x1ad   :  { %2670 = vmatmul.mubr.msk.f32.gmra.mxu0 %vm1086_vm2, %v3728_v4  ;;  %2622 = vmatmul.mubr.msk.f32.gmra.mxu1 %vm1086_vm2, %v3872_v38  ;;  %v2927_v4 = vpop.f32.mrf.mxu0 }
 0x1ae   :  { %1948 = vmatprep.mubr.f32.mxu0 %v2969_v55  ;;  %1595 = vmatprep.mubr.f32.mxu1 %v2969_v55 }
 0x1b1   :  { %2671 = vmatmul.mubr.msk.f32.gmra.mxu0 %vm1086_vm2, %v3739_v6  ;;  %2623 = vmatmul.mubr.msk.f32.gmra.mxu1 %vm1086_vm2, %v3881_v40  ;;  %v3980_v6 = vadd.f32 %v2924_v60, %v3548_v9 }
 0x1b2   :  { %1954 = vmatprep.mubr.f32.mxu0 %v2969_v55  ;;  %1601 = vmatprep.mubr.f32.mxu1 %v2969_v55 }
 0x1b5   :  { %2672 = vmatmul.mubr.msk.f32.gmra.mxu0 %vm1086_vm2, %v3746_v10  ;;  %2624 = vmatmul.mubr.msk.f32.gmra.mxu1 %vm1086_vm2, %v3890_v42  ;;  %v1037_v10 = vpop.f32.mrf.mxu0 }
 0x1b6   :  { %1960 = vmatprep.mubr.f32.mxu0 %v2969_v55  ;;  %1607 = vmatprep.mubr.f32.mxu1 %v2969_v55 }
 0x1b9   :  { %2673 = vmatmul.mubr.msk.f32.gmra.mxu0 %vm1086_vm2, %v3757_v12  ;;  %2625 = vmatmul.mubr.msk.f32.gmra.mxu1 %vm1086_vm2, %v3899_v44  ;;  %v3989_v12 = vadd.f32 %v3548_v9, %v1037_v10 }
 0x1ba   :  { %1966 = vmatprep.mubr.f32.mxu0 %v2969_v55  ;;  %1613 = vmatprep.mubr.f32.mxu1 %v2969_v55 }
 0x1bd   :  { %2674 = vmatmul.mubr.msk.f32.gmra.mxu0 %vm1086_vm2, %v3764_v14  ;;  %2626 = vmatmul.mubr.msk.f32.gmra.mxu1 %vm1086_vm2, %v3908_v46  ;;  %v2930_v14 = vpop.f32.mrf.mxu0 }
 0x1be   :  { %1972 = vmatprep.mubr.f32.mxu0 %v2969_v55  ;;  %1619 = vmatprep.mubr.f32.mxu1 %v2969_v55 }
 0x1c1   :  { %2675 = vmatmul.mubr.msk.f32.gmra.mxu0 %vm1086_vm2, %v3775_v16  ;;  %2627 = vmatmul.mubr.msk.f32.gmra.mxu1 %vm1086_vm2, %v3917_v48  ;;  %v3998_v16 = vadd.f32 %v2927_v4, %v3548_v9 }
 0x1c2   :  { %1978 = vmatprep.mubr.f32.mxu0 %v2969_v55  ;;  %1625 = vmatprep.mubr.f32.mxu1 %v2969_v55 }
 0x1c5   :  { %2676 = vmatmul.mubr.msk.f32.gmra.mxu0 %vm1086_vm2, %v3782_v18  ;;  %2628 = vmatmul.mubr.msk.f32.gmra.mxu1 %vm1086_vm2, %v3926_v50  ;;  %v1047_v18 = vpop.f32.mrf.mxu0 }
 0x1c6   :  { %1984 = vmatprep.mubr.f32.mxu0 %v2969_v55  ;;  %1631 = vmatprep.mubr.f32.mxu1 %v2969_v55 }
 0x1c9   :  { %2677 = vmatmul.mubr.msk.f32.gmra.mxu0 %vm1086_vm2, %v3793_v20  ;;  %v1345_v56 = vpop.f32.mrf.mxu1  ;;  %2629 = vmatmul.mubr.msk.f32.gmra.mxu1 %vm1086_vm2, %v3935_v52  ;;  %v4007_v20 = vadd.f32 %v3548_v9, %v1047_v18 }
 0x1ca   :  { %1990 = vmatprep.mubr.f32.mxu0 %v2969_v55  ;;  %2177 = vst [vmem:[#allocation2] sm:$0xff] %v1345_v56  ;;  %1637 = vmatprep.mubr.f32.mxu1 %v2969_v55 }
 0x1cb   :  { %v1347_v57 = vpop.f32.mrf.mxu1 }
 0x1cc   :  { %2178 = vst [vmem:[#allocation2 + $0x8] sm:$0xff] %v1347_v57 }
 0x1cd   :  { %2678 = vmatmul.mubr.msk.f32.gmra.mxu0 %vm1086_vm2, %v3800_v22  ;;  %v1351_v59 = vpop.f32.mrf.mxu1  ;;  %2630 = vmatmul.mubr.msk.f32.gmra.mxu1 %vm1086_vm2, %v3944_v54  ;;  %v2933_v22 = vpop.f32.mrf.mxu0 }
 0x1ce   :  { %1996 = vmatprep.mubr.f32.mxu0 %v2969_v55  ;;  %2181 = vst [vmem:[#allocation2 + $0x20] sm:$0xff] %v1351_v59  ;;  %1643 = vmatprep.mubr.f32.mxu1 %v2969_v55 }
 0x1cf   :  { %v1353_v61 = vpop.f32.mrf.mxu1 }
 0x1d0   :  { %2182 = vst [vmem:[#allocation2 + $0x28] sm:$0xff] %v1353_v61 }
 0x1d1   :  { %2679 = vmatmul.mubr.msk.f32.gmra.mxu0 %vm1086_vm2, %v3811_v24  ;;  %v1357_v63 = vpop.f32.mrf.mxu1  ;;  %2631 = vmatmul.mubr.msk.f32.gmra.mxu1 %vm1086_vm2, %v3953_v58  ;;  %v4016_v24 = vadd.f32 %v2930_v14, %v3548_v9 }
 0x1d2   :  { %2002 = vmatprep.mubr.f32.mxu0 %v2969_v55  ;;  %2185 = vst [vmem:[#allocation2 + $0x40] sm:$0xff] %v1357_v63  ;;  %1649 = vmatprep.mubr.f32.mxu1 %v2969_v55 }
 0x1d3   :  { %v1359_v1 = vpop.f32.mrf.mxu1 }
 0x1d4   :  { %2186 = vst [vmem:[#allocation2 + $0x48] sm:$0xff] %v1359_v1 }
 0x1d5   :  { %2680 = vmatmul.mubr.msk.f32.gmra.mxu0 %vm1086_vm2, %v3818_v26  ;;  %v1363_v3 = vpop.f32.mrf.mxu1  ;;  %2632 = vmatmul.mubr.msk.f32.gmra.mxu1 %vm1086_vm2, %v3962_v62  ;;  %v1057_v26 = vpop.f32.mrf.mxu0 }
 0x1d6   :  { %2008 = vmatprep.mubr.f32.mxu0 %v2969_v55  ;;  %2189 = vst [vmem:[#allocation2 + $0x60] sm:$0xff] %v1363_v3  ;;  %1655 = vmatprep.mubr.f32.mxu1 %v2969_v55 }
 0x1d7   :  { %v1365_v5 = vpop.f32.mrf.mxu1 }
 0x1d8   :  { %2190 = vst [vmem:[#allocation2 + $0x68] sm:$0xff] %v1365_v5 }
 0x1d9   :  { %2681 = vmatmul.mubr.msk.f32.gmra.mxu0 %vm1086_vm2, %v3827_v28  ;;  %v1369_v7 = vpop.f32.mrf.mxu1  ;;  %2633 = vmatmul.mubr.msk.f32.gmra.mxu1 %vm1086_vm2, %v3971_v2  ;;  %v4025_v28 = vadd.f32 %v3548_v9, %v1057_v26 }
 0x1da   :  { %2014 = vmatprep.mubr.f32.mxu0 %v2969_v55  ;;  %2193 = vst [vmem:[#allocation2 + $0x80] sm:$0xff] %v1369_v7  ;;  %1661 = vmatprep.mubr.f32.mxu1 %v2969_v55 }
 0x1db   :  { %v1371_v11 = vpop.f32.mrf.mxu1 }
 0x1dc   :  { %2194 = vst [vmem:[#allocation2 + $0x88] sm:$0xff] %v1371_v11 }
 0x1dd   :  { %2682 = vmatmul.mubr.msk.f32.gmra.mxu0 %vm1086_vm2, %v3836_v30  ;;  %v1375_v13 = vpop.f32.mrf.mxu1  ;;  %2634 = vmatmul.mubr.msk.f32.gmra.mxu1 %vm1086_vm2, %v3980_v6  ;;  %v2936_v30 = vpop.f32.mrf.mxu0 }
 0x1de   :  { %2020 = vmatprep.mubr.f32.mxu0 %v2969_v55  ;;  %2197 = vst [vmem:[#allocation2 + $0xa0] sm:$0xff] %v1375_v13  ;;  %1667 = vmatprep.mubr.f32.mxu1 %v2969_v55 }
 0x1df   :  { %v1377_v15 = vpop.f32.mrf.mxu1 }
 0x1e0   :  { %2198 = vst [vmem:[#allocation2 + $0xa8] sm:$0xff] %v1377_v15 }
 0x1e1   :  { %2683 = vmatmul.mubr.msk.f32.gmra.mxu0 %vm1086_vm2, %v3845_v32  ;;  %v1381_v17 = vpop.f32.mrf.mxu1  ;;  %2635 = vmatmul.mubr.msk.f32.gmra.mxu1 %vm1086_vm2, %v3989_v12  ;;  %v4034_v32 = vadd.f32 %v2933_v22, %v3548_v9 }
 0x1e2   :  { %2026 = vmatprep.mubr.f32.mxu0 %v2969_v55  ;;  %2201 = vst [vmem:[#allocation2 + $0xc0] sm:$0xff] %v1381_v17  ;;  %1673 = vmatprep.mubr.f32.mxu1 %v2969_v55 }
 0x1e3   :  { %v1383_v19 = vpop.f32.mrf.mxu1 }
 0x1e4   :  { %2202 = vst [vmem:[#allocation2 + $0xc8] sm:$0xff] %v1383_v19 }
 0x1e5   :  { %2684 = vmatmul.mubr.msk.f32.gmra.mxu0 %vm1086_vm2, %v3854_v34  ;;  %v1387_v21 = vpop.f32.mrf.mxu1  ;;  %2636 = vmatmul.mubr.msk.f32.gmra.mxu1 %vm1086_vm2, %v3998_v16  ;;  %v1067_v34 = vpop.f32.mrf.mxu0 }
 0x1e6   :  { %2032 = vmatprep.mubr.f32.mxu0 %v2969_v55  ;;  %2205 = vst [vmem:[#allocation2 + $0xe0] sm:$0xff] %v1387_v21  ;;  %1679 = vmatprep.mubr.f32.mxu1 %v2969_v55 }
 0x1e7   :  { %v1389_v23 = vpop.f32.mrf.mxu1 }
 0x1e8   :  { %2206 = vst [vmem:[#allocation2 + $0xe8] sm:$0xff] %v1389_v23 }
 0x1e9   :  { %2685 = vmatmul.mubr.msk.f32.gmra.mxu0 %vm1086_vm2, %v3863_v36  ;;  %v1393_v25 = vpop.f32.mrf.mxu1  ;;  %2637 = vmatmul.mubr.msk.f32.gmra.mxu1 %vm1086_vm2, %v4007_v20  ;;  %v4043_v36 = vadd.f32 %v3548_v9, %v1067_v34 }
 0x1ea   :  { %2038 = vmatprep.mubr.f32.mxu0 %v2969_v55  ;;  %2209 = vst [vmem:[#allocation2 + $0x100] sm:$0xff] %v1393_v25  ;;  %1685 = vmatprep.mubr.f32.mxu1 %v2969_v55 }
 0x1eb   :  { %v1395_v27 = vpop.f32.mrf.mxu1 }
 0x1ec   :  { %2210 = vst [vmem:[#allocation2 + $0x108] sm:$0xff] %v1395_v27 }
 0x1ed   :  { %2686 = vmatmul.mubr.msk.f32.gmra.mxu0 %vm1086_vm2, %v3872_v38  ;;  %v1399_v29 = vpop.f32.mrf.mxu1  ;;  %2638 = vmatmul.mubr.msk.f32.gmra.mxu1 %vm1086_vm2, %v4016_v24  ;;  %v2939_v38 = vpop.f32.mrf.mxu0 }
 0x1ee   :  { %2044 = vmatprep.mubr.f32.mxu0 %v2969_v55  ;;  %2213 = vst [vmem:[#allocation2 + $0x120] sm:$0xff] %v1399_v29  ;;  %1691 = vmatprep.mubr.f32.mxu1 %v2969_v55  ;;  %v4070_v49 = vadd.f32 %v2939_v38, %v3548_v9 }
 0x1ef   :  { %v1401_v31 = vpop.f32.mrf.mxu1 }
 0x1f0   :  { %2214 = vst [vmem:[#allocation2 + $0x128] sm:$0xff] %v1401_v31 }
 0x1f1   :  { %2687 = vmatmul.mubr.msk.f32.gmra.mxu0 %vm1086_vm2, %v3881_v40  ;;  %v1405_v33 = vpop.f32.mrf.mxu1  ;;  %2639 = vmatmul.mubr.msk.f32.gmra.mxu1 %vm1086_vm2, %v4025_v28  ;;  %v4052_v40 = vadd.f32 %v2936_v30, %v3548_v9 }
 0x1f2   :  { %2050 = vmatprep.mubr.f32.mxu0 %v2969_v55  ;;  %2217 = vst [vmem:[#allocation2 + $0x140] sm:$0xff] %v1405_v33  ;;  %1697 = vmatprep.mubr.f32.mxu1 %v2969_v55 }
 0x1f3   :  { %v1407_v35 = vpop.f32.mrf.mxu1 }
 0x1f4   :  { %2218 = vst [vmem:[#allocation2 + $0x148] sm:$0xff] %v1407_v35 }
 0x1f5   :  { %2688 = vmatmul.mubr.msk.f32.gmra.mxu0 %vm1086_vm2, %v3890_v42  ;;  %v1411_v37 = vpop.f32.mrf.mxu1  ;;  %2640 = vmatmul.mubr.msk.f32.gmra.mxu1 %vm1086_vm2, %v4034_v32  ;;  %v1077_v42 = vpop.f32.mrf.mxu0 }
 0x1f6   :  { %2056 = vmatprep.mubr.f32.mxu0 %v2969_v55  ;;  %2221 = vst [vmem:[#allocation2 + $0x160] sm:$0xff] %v1411_v37  ;;  %1703 = vmatprep.mubr.f32.mxu1 %v2969_v55 }
 0x1f7   :  { %v1413_v39 = vpop.f32.mrf.mxu1 }
 0x1f8   :  { %2222 = vst [vmem:[#allocation2 + $0x168] sm:$0xff] %v1413_v39 }
 0x1f9   :  { %2689 = vmatmul.mubr.msk.f32.gmra.mxu0 %vm1086_vm2, %v3899_v44  ;;  %v1417_v41 = vpop.f32.mrf.mxu1  ;;  %2641 = vmatmul.mubr.msk.f32.gmra.mxu1 %vm1086_vm2, %v4043_v36  ;;  %v4061_v44 = vadd.f32 %v3548_v9, %v1077_v42 }
 0x1fa   :  { %2062 = vmatprep.mubr.f32.mxu0 %v2969_v55  ;;  %2225 = vst [vmem:[#allocation2 + $0x180] sm:$0xff] %v1417_v41  ;;  %1709 = vmatprep.mubr.f32.mxu1 %v2969_v55 }
 0x1fb   :  { %v1419_v43 = vpop.f32.mrf.mxu1 }
 0x1fc   :  { %2226 = vst [vmem:[#allocation2 + $0x188] sm:$0xff] %v1419_v43 }
 0x1fd   :  { %2690 = vmatmul.mubr.msk.f32.gmra.mxu0 %vm1086_vm2, %v3908_v46  ;;  %v1423_v45 = vpop.f32.mrf.mxu1  ;;  %2642 = vmatmul.mubr.msk.f32.gmra.mxu1 %vm1086_vm2, %v4052_v40 }
 0x1fe   :  { %2068 = vmatprep.mubr.f32.mxu0 %v2969_v55  ;;  %2229 = vst [vmem:[#allocation2 + $0x1a0] sm:$0xff] %v1423_v45  ;;  %1715 = vmatprep.mubr.f32.mxu1 %v2969_v55 }
 0x1ff   :  { %v1425_v47 = vpop.f32.mrf.mxu1 }
 0x200   :  { %2230 = vst [vmem:[#allocation2 + $0x1a8] sm:$0xff] %v1425_v47 }
 0x201   :  { %2691 = vmatmul.mubr.msk.f32.gmra.mxu0 %vm1086_vm2, %v3917_v48  ;;  %v1429_v46 = vpop.f32.mrf.mxu1  ;;  %2643 = vmatmul.mubr.msk.f32.gmra.mxu1 %vm1086_vm2, %v4061_v44 }
 0x202   :  { %2074 = vmatprep.mubr.f32.mxu0 %v2969_v55  ;;  %2233 = vst [vmem:[#allocation2 + $0x1c0] sm:$0xff] %v1429_v46  ;;  %1721 = vmatprep.mubr.f32.mxu1 %v2969_v55 }
 0x203   :  { %v1431_v51 = vpop.f32.mrf.mxu1 }
 0x204   :  { %2234 = vst [vmem:[#allocation2 + $0x1c8] sm:$0xff] %v1431_v51 }
 0x205   :  { %2692 = vmatmul.mubr.msk.f32.gmra.mxu0 %vm1086_vm2, %v3926_v50  ;;  %v1435_v53 = vpop.f32.mrf.mxu1  ;;  %2644 = vmatmul.mubr.msk.f32.gmra.mxu1 %vm1086_vm2, %v4070_v49 }
 0x206   :  { %2080 = vmatprep.mubr.f32.mxu0 %v2969_v55  ;;  %2237 = vst [vmem:[#allocation2 + $0x1e0] sm:$0xff] %v1435_v53 }
 0x207   :  { %v1437_v9 = vpop.f32.mrf.mxu1 }
 0x208   :  { %2238 = vst [vmem:[#allocation2 + $0x1e8] sm:$0xff] %v1437_v9 }
 0x209   :  { %v1794_v48 = vpop.f32.mrf.mxu0  ;;  %2693 = vmatmul.mubr.msk.f32.gmra.mxu0 %vm1086_vm2, %v3935_v52  ;;  %v1441_v56 = vpop.f32.mrf.mxu1 }
 0x20a   :  { %2179 = vst [vmem:[#allocation2 + $0x10] sm:$0xff] %v1794_v48  ;;  %2086 = vmatprep.mubr.f32.mxu0 %v2969_v55  ;;  %2241 = vst [vmem:[#allocation2 + $0x200] sm:$0xff] %v1441_v56 }
 0x20b   :  { %v1796_v8 = vpop.f32.mrf.mxu0  ;;  %v1443_v50 = vpop.f32.mrf.mxu1 }
 0x20c   :  { %2180 = vst [vmem:[#allocation2 + $0x18] sm:$0xff] %v1796_v8  ;;  %2242 = vst [vmem:[#allocation2 + $0x208] sm:$0xff] %v1443_v50 }
 0x20d   :  { %v1800_v57 = vpop.f32.mrf.mxu0  ;;  %2694 = vmatmul.mubr.msk.f32.gmra.mxu0 %vm1086_vm2, %v3944_v54  ;;  %v1447_v59 = vpop.f32.mrf.mxu1 }
 0x20e   :  { %2183 = vst [vmem:[#allocation2 + $0x30] sm:$0xff] %v1800_v57  ;;  %2092 = vmatprep.mubr.f32.mxu0 %v2969_v55  ;;  %2245 = vst [vmem:[#allocation2 + $0x220] sm:$0xff] %v1447_v59 }
 0x20f   :  { %v1802_v60 = vpop.f32.mrf.mxu0  ;;  %v1449_v52 = vpop.f32.mrf.mxu1 }
 0x210   :  { %2184 = vst [vmem:[#allocation2 + $0x38] sm:$0xff] %v1802_v60  ;;  %2246 = vst [vmem:[#allocation2 + $0x228] sm:$0xff] %v1449_v52 }
 0x211   :  { %v1806_v61 = vpop.f32.mrf.mxu0  ;;  %2695 = vmatmul.mubr.msk.f32.gmra.mxu0 %vm1086_vm2, %v3953_v58  ;;  %v1453_v63 = vpop.f32.mrf.mxu1 }
 0x212   :  { %2187 = vst [vmem:[#allocation2 + $0x50] sm:$0xff] %v1806_v61  ;;  %2098 = vmatprep.mubr.f32.mxu0 %v2969_v55  ;;  %2249 = vst [vmem:[#allocation2 + $0x240] sm:$0xff] %v1453_v63 }
 0x213   :  { %v1808_v0 = vpop.f32.mrf.mxu0  ;;  %v1455_v54 = vpop.f32.mrf.mxu1 }
 0x214   :  { %2188 = vst [vmem:[#allocation2 + $0x58] sm:$0xff] %v1808_v0  ;;  %2250 = vst [vmem:[#allocation2 + $0x248] sm:$0xff] %v1455_v54 }
 0x215   :  { %v1812_v1 = vpop.f32.mrf.mxu0  ;;  %2696 = vmatmul.mubr.msk.f32.gmra.mxu0 %vm1086_vm2, %v3962_v62  ;;  %v1459_v3 = vpop.f32.mrf.mxu1 }
 0x216   :  { %2191 = vst [vmem:[#allocation2 + $0x70] sm:$0xff] %v1812_v1  ;;  %2104 = vmatprep.mubr.f32.mxu0 %v2969_v55  ;;  %2253 = vst [vmem:[#allocation2 + $0x260] sm:$0xff] %v1459_v3 }
 0x217   :  { %v1814_v4 = vpop.f32.mrf.mxu0  ;;  %v1461_v58 = vpop.f32.mrf.mxu1 }
 0x218   :  { %2192 = vst [vmem:[#allocation2 + $0x78] sm:$0xff] %v1814_v4  ;;  %2254 = vst [vmem:[#allocation2 + $0x268] sm:$0xff] %v1461_v58 }
 0x219   :  { %v1818_v5 = vpop.f32.mrf.mxu0  ;;  %2697 = vmatmul.mubr.msk.f32.gmra.mxu0 %vm1086_vm2, %v3971_v2  ;;  %v1465_v7 = vpop.f32.mrf.mxu1 }
 0x21a   :  { %2195 = vst [vmem:[#allocation2 + $0x90] sm:$0xff] %v1818_v5  ;;  %2110 = vmatprep.mubr.f32.mxu0 %v2969_v55  ;;  %2257 = vst [vmem:[#allocation2 + $0x280] sm:$0xff] %v1465_v7 }
 0x21b   :  { %v1820_v10 = vpop.f32.mrf.mxu0  ;;  %v1467_v62 = vpop.f32.mrf.mxu1 }
 0x21c   :  { %2196 = vst [vmem:[#allocation2 + $0x98] sm:$0xff] %v1820_v10  ;;  %2258 = vst [vmem:[#allocation2 + $0x288] sm:$0xff] %v1467_v62 }
 0x21d   :  { %v1824_v11 = vpop.f32.mrf.mxu0  ;;  %2698 = vmatmul.mubr.msk.f32.gmra.mxu0 %vm1086_vm2, %v3980_v6  ;;  %v1471_v13 = vpop.f32.mrf.mxu1 }
 0x21e   :  { %2199 = vst [vmem:[#allocation2 + $0xb0] sm:$0xff] %v1824_v11  ;;  %2116 = vmatprep.mubr.f32.mxu0 %v2969_v55  ;;  %2261 = vst [vmem:[#allocation2 + $0x2a0] sm:$0xff] %v1471_v13 }
 0x21f   :  { %v1826_v14 = vpop.f32.mrf.mxu0  ;;  %v1473_v2 = vpop.f32.mrf.mxu1 }
 0x220   :  { %2200 = vst [vmem:[#allocation2 + $0xb8] sm:$0xff] %v1826_v14  ;;  %2262 = vst [vmem:[#allocation2 + $0x2a8] sm:$0xff] %v1473_v2 }
 0x221   :  { %v1830_v15 = vpop.f32.mrf.mxu0  ;;  %2699 = vmatmul.mubr.msk.f32.gmra.mxu0 %vm1086_vm2, %v3989_v12  ;;  %v1477_v17 = vpop.f32.mrf.mxu1 }
 0x222   :  { %2203 = vst [vmem:[#allocation2 + $0xd0] sm:$0xff] %v1830_v15  ;;  %2122 = vmatprep.mubr.f32.mxu0 %v2969_v55  ;;  %2265 = vst [vmem:[#allocation2 + $0x2c0] sm:$0xff] %v1477_v17 }
 0x223   :  { %v1832_v18 = vpop.f32.mrf.mxu0  ;;  %v1479_v6 = vpop.f32.mrf.mxu1 }
 0x224   :  { %2204 = vst [vmem:[#allocation2 + $0xd8] sm:$0xff] %v1832_v18  ;;  %2266 = vst [vmem:[#allocation2 + $0x2c8] sm:$0xff] %v1479_v6 }
 0x225   :  { %v1836_v19 = vpop.f32.mrf.mxu0  ;;  %2700 = vmatmul.mubr.msk.f32.gmra.mxu0 %vm1086_vm2, %v3998_v16  ;;  %v1483_v21 = vpop.f32.mrf.mxu1 }
 0x226   :  { %2207 = vst [vmem:[#allocation2 + $0xf0] sm:$0xff] %v1836_v19  ;;  %2128 = vmatprep.mubr.f32.mxu0 %v2969_v55  ;;  %2269 = vst [vmem:[#allocation2 + $0x2e0] sm:$0xff] %v1483_v21 }
 0x227   :  { %v1838_v22 = vpop.f32.mrf.mxu0  ;;  %v1485_v12 = vpop.f32.mrf.mxu1 }
 0x228   :  { %2208 = vst [vmem:[#allocation2 + $0xf8] sm:$0xff] %v1838_v22  ;;  %2270 = vst [vmem:[#allocation2 + $0x2e8] sm:$0xff] %v1485_v12 }
 0x229   :  { %v1842_v23 = vpop.f32.mrf.mxu0  ;;  %2701 = vmatmul.mubr.msk.f32.gmra.mxu0 %vm1086_vm2, %v4007_v20  ;;  %v1489_v25 = vpop.f32.mrf.mxu1 }
 0x22a   :  { %2211 = vst [vmem:[#allocation2 + $0x110] sm:$0xff] %v1842_v23  ;;  %2134 = vmatprep.mubr.f32.mxu0 %v2969_v55  ;;  %2273 = vst [vmem:[#allocation2 + $0x300] sm:$0xff] %v1489_v25 }
 0x22b   :  { %v1844_v26 = vpop.f32.mrf.mxu0  ;;  %v1491_v16 = vpop.f32.mrf.mxu1 }
 0x22c   :  { %2212 = vst [vmem:[#allocation2 + $0x118] sm:$0xff] %v1844_v26  ;;  %2274 = vst [vmem:[#allocation2 + $0x308] sm:$0xff] %v1491_v16 }
 0x22d   :  { %v1848_v27 = vpop.f32.mrf.mxu0  ;;  %2702 = vmatmul.mubr.msk.f32.gmra.mxu0 %vm1086_vm2, %v4016_v24  ;;  %v1495_v29 = vpop.f32.mrf.mxu1 }
 0x22e   :  { %2215 = vst [vmem:[#allocation2 + $0x130] sm:$0xff] %v1848_v27  ;;  %2140 = vmatprep.mubr.f32.mxu0 %v2969_v55  ;;  %2277 = vst [vmem:[#allocation2 + $0x320] sm:$0xff] %v1495_v29 }
 0x22f   :  { %v1850_v30 = vpop.f32.mrf.mxu0  ;;  %v1497_v20 = vpop.f32.mrf.mxu1 }
 0x230   :  { %2216 = vst [vmem:[#allocation2 + $0x138] sm:$0xff] %v1850_v30  ;;  %2278 = vst [vmem:[#allocation2 + $0x328] sm:$0xff] %v1497_v20 }
 0x231   :  { %v1854_v31 = vpop.f32.mrf.mxu0  ;;  %2703 = vmatmul.mubr.msk.f32.gmra.mxu0 %vm1086_vm2, %v4025_v28  ;;  %v1501_v33 = vpop.f32.mrf.mxu1 }
 0x232   :  { %2219 = vst [vmem:[#allocation2 + $0x150] sm:$0xff] %v1854_v31  ;;  %2146 = vmatprep.mubr.f32.mxu0 %v2969_v55  ;;  %2281 = vst [vmem:[#allocation2 + $0x340] sm:$0xff] %v1501_v33 }
 0x233   :  { %v1856_v34 = vpop.f32.mrf.mxu0  ;;  %v1503_v24 = vpop.f32.mrf.mxu1 }
 0x234   :  { %2220 = vst [vmem:[#allocation2 + $0x158] sm:$0xff] %v1856_v34  ;;  %2282 = vst [vmem:[#allocation2 + $0x348] sm:$0xff] %v1503_v24 }
 0x235   :  { %v1860_v35 = vpop.f32.mrf.mxu0  ;;  %2704 = vmatmul.mubr.msk.f32.gmra.mxu0 %vm1086_vm2, %v4034_v32  ;;  %v1507_v37 = vpop.f32.mrf.mxu1 }
 0x236   :  { %2223 = vst [vmem:[#allocation2 + $0x170] sm:$0xff] %v1860_v35  ;;  %2152 = vmatprep.mubr.f32.mxu0 %v2969_v55  ;;  %2285 = vst [vmem:[#allocation2 + $0x360] sm:$0xff] %v1507_v37 }
 0x237   :  { %v1862_v38 = vpop.f32.mrf.mxu0  ;;  %v1509_v28 = vpop.f32.mrf.mxu1 }
 0x238   :  { %2224 = vst [vmem:[#allocation2 + $0x178] sm:$0xff] %v1862_v38  ;;  %2286 = vst [vmem:[#allocation2 + $0x368] sm:$0xff] %v1509_v28 }
 0x239   :  { %v1866_v39 = vpop.f32.mrf.mxu0  ;;  %2705 = vmatmul.mubr.msk.f32.gmra.mxu0 %vm1086_vm2, %v4043_v36  ;;  %v1513_v41 = vpop.f32.mrf.mxu1 }
 0x23a   :  { %2227 = vst [vmem:[#allocation2 + $0x190] sm:$0xff] %v1866_v39  ;;  %2158 = vmatprep.mubr.f32.mxu0 %v2969_v55  ;;  %2289 = vst [vmem:[#allocation2 + $0x380] sm:$0xff] %v1513_v41 }
 0x23b   :  { %v1868_v42 = vpop.f32.mrf.mxu0  ;;  %v1515_v32 = vpop.f32.mrf.mxu1 }
 0x23c   :  { %2228 = vst [vmem:[#allocation2 + $0x198] sm:$0xff] %v1868_v42  ;;  %2290 = vst [vmem:[#allocation2 + $0x388] sm:$0xff] %v1515_v32 }
 0x23d   :  { %v1872_v43 = vpop.f32.mrf.mxu0  ;;  %2706 = vmatmul.mubr.msk.f32.gmra.mxu0 %vm1086_vm2, %v4052_v40  ;;  %v1519_v45 = vpop.f32.mrf.mxu1 }
 0x23e   :  { %2231 = vst [vmem:[#allocation2 + $0x1b0] sm:$0xff] %v1872_v43  ;;  %2164 = vmatprep.mubr.f32.mxu0 %v2969_v55  ;;  %2293 = vst [vmem:[#allocation2 + $0x3a0] sm:$0xff] %v1519_v45 }
 0x23f   :  { %v1874_v47 = vpop.f32.mrf.mxu0  ;;  %v1521_v36 = vpop.f32.mrf.mxu1 }
 0x240   :  { %2232 = vst [vmem:[#allocation2 + $0x1b8] sm:$0xff] %v1874_v47  ;;  %2294 = vst [vmem:[#allocation2 + $0x3a8] sm:$0xff] %v1521_v36 }
 0x241   :  { %v1878_v46 = vpop.f32.mrf.mxu0  ;;  %2707 = vmatmul.mubr.msk.f32.gmra.mxu0 %vm1086_vm2, %v4061_v44  ;;  %v1525_v51 = vpop.f32.mrf.mxu1 }
 0x242   :  { %2235 = vst [vmem:[#allocation2 + $0x1d0] sm:$0xff] %v1878_v46  ;;  %2170 = vmatprep.mubr.f32.mxu0 %v2969_v55  ;;  %2297 = vst [vmem:[#allocation2 + $0x3c0] sm:$0xff] %v1525_v51 }
 0x243   :  { %v1880_v53 = vpop.f32.mrf.mxu0  ;;  %v1527_v40 = vpop.f32.mrf.mxu1 }
 0x244   :  { %2236 = vst [vmem:[#allocation2 + $0x1d8] sm:$0xff] %v1880_v53  ;;  %2298 = vst [vmem:[#allocation2 + $0x3c8] sm:$0xff] %v1527_v40 }
 0x245   :  { %v1884_v9 = vpop.f32.mrf.mxu0  ;;  %2708 = vmatmul.mubr.msk.f32.gmra.mxu0 %vm1086_vm2, %v4070_v49  ;;  %v1531_v48 = vpop.f32.mrf.mxu1 }
 0x246   :  { %2239 = vst [vmem:[#allocation2 + $0x1f0] sm:$0xff] %v1884_v9  ;;  %2301 = vst [vmem:[#allocation2 + $0x3e0] sm:$0xff] %v1531_v48 }
 0x247   :  { %v1886_v56 = vpop.f32.mrf.mxu0  ;;  %v1533_v8 = vpop.f32.mrf.mxu1 }
 0x248   :  { %2240 = vst [vmem:[#allocation2 + $0x1f8] sm:$0xff] %v1886_v56  ;;  %2302 = vst [vmem:[#allocation2 + $0x3e8] sm:$0xff] %v1533_v8 }
 0x249   :  { %v1890_v44 = vpop.f32.mrf.mxu0  ;;  %v1537_v50 = vpop.f32.mrf.mxu1 }
 0x24a   :  { %2243 = vst [vmem:[#allocation2 + $0x210] sm:$0xff] %v1890_v44  ;;  %2305 = vst [vmem:[#allocation2 + $0x400] sm:$0xff] %v1537_v50 }
 0x24b   :  { %v1892_v55 = vpop.f32.mrf.mxu0  ;;  %v1539_v57 = vpop.f32.mrf.mxu1 }
 0x24c   :  { %2244 = vst [vmem:[#allocation2 + $0x218] sm:$0xff] %v1892_v55  ;;  %2306 = vst [vmem:[#allocation2 + $0x408] sm:$0xff] %v1539_v57 }
 0x24d   :  { %v1896_v59 = vpop.f32.mrf.mxu0  ;;  %v1543_v60 = vpop.f32.mrf.mxu1 }
 0x24e   :  { %2247 = vst [vmem:[#allocation2 + $0x230] sm:$0xff] %v1896_v59  ;;  %2309 = vst [vmem:[#allocation2 + $0x420] sm:$0xff] %v1543_v60 }
 0x24f   :  { %v1898_v49 = vpop.f32.mrf.mxu0  ;;  %v1545_v52 = vpop.f32.mrf.mxu1 }
 0x250   :  { %2248 = vst [vmem:[#allocation2 + $0x238] sm:$0xff] %v1898_v49  ;;  %2310 = vst [vmem:[#allocation2 + $0x428] sm:$0xff] %v1545_v52 }
 0x251   :  { %v1902_v61 = vpop.f32.mrf.mxu0  ;;  %v1549_v63 = vpop.f32.mrf.mxu1 }
 0x252   :  { %2251 = vst [vmem:[#allocation2 + $0x250] sm:$0xff] %v1902_v61  ;;  %2313 = vst [vmem:[#allocation2 + $0x440] sm:$0xff] %v1549_v63 }
 0x253   :  { %v1904_v0 = vpop.f32.mrf.mxu0  ;;  %v1551_v54 = vpop.f32.mrf.mxu1 }
 0x254   :  { %2252 = vst [vmem:[#allocation2 + $0x258] sm:$0xff] %v1904_v0  ;;  %2314 = vst [vmem:[#allocation2 + $0x448] sm:$0xff] %v1551_v54 }
 0x255   :  { %v1908_v1 = vpop.f32.mrf.mxu0  ;;  %v1555_v3 = vpop.f32.mrf.mxu1 }
 0x256   :  { %2255 = vst [vmem:[#allocation2 + $0x270] sm:$0xff] %v1908_v1  ;;  %2317 = vst [vmem:[#allocation2 + $0x460] sm:$0xff] %v1555_v3 }
 0x257   :  { %v1910_v4 = vpop.f32.mrf.mxu0  ;;  %v1557_v58 = vpop.f32.mrf.mxu1 }
 0x258   :  { %2256 = vst [vmem:[#allocation2 + $0x278] sm:$0xff] %v1910_v4  ;;  %2318 = vst [vmem:[#allocation2 + $0x468] sm:$0xff] %v1557_v58 }
 0x259   :  { %v1914_v5 = vpop.f32.mrf.mxu0  ;;  %v1561_v7 = vpop.f32.mrf.mxu1 }
 0x25a   :  { %2259 = vst [vmem:[#allocation2 + $0x290] sm:$0xff] %v1914_v5  ;;  %2321 = vst [vmem:[#allocation2 + $0x480] sm:$0xff] %v1561_v7 }
 0x25b   :  { %v1916_v10 = vpop.f32.mrf.mxu0  ;;  %v1563_v62 = vpop.f32.mrf.mxu1 }
 0x25c   :  { %2260 = vst [vmem:[#allocation2 + $0x298] sm:$0xff] %v1916_v10  ;;  %2322 = vst [vmem:[#allocation2 + $0x488] sm:$0xff] %v1563_v62 }
 0x25d   :  { %v1920_v11 = vpop.f32.mrf.mxu0  ;;  %v1567_v13 = vpop.f32.mrf.mxu1 }
 0x25e   :  { %2263 = vst [vmem:[#allocation2 + $0x2b0] sm:$0xff] %v1920_v11  ;;  %2325 = vst [vmem:[#allocation2 + $0x4a0] sm:$0xff] %v1567_v13 }
 0x25f   :  { %v1922_v14 = vpop.f32.mrf.mxu0  ;;  %v1569_v2 = vpop.f32.mrf.mxu1 }
 0x260   :  { %2264 = vst [vmem:[#allocation2 + $0x2b8] sm:$0xff] %v1922_v14  ;;  %2326 = vst [vmem:[#allocation2 + $0x4a8] sm:$0xff] %v1569_v2 }
 0x261   :  { %v1926_v15 = vpop.f32.mrf.mxu0  ;;  %v1573_v17 = vpop.f32.mrf.mxu1 }
 0x262   :  { %2267 = vst [vmem:[#allocation2 + $0x2d0] sm:$0xff] %v1926_v15  ;;  %2329 = vst [vmem:[#allocation2 + $0x4c0] sm:$0xff] %v1573_v17 }
 0x263   :  { %v1928_v18 = vpop.f32.mrf.mxu0  ;;  %v1575_v6 = vpop.f32.mrf.mxu1 }
 0x264   :  { %2268 = vst [vmem:[#allocation2 + $0x2d8] sm:$0xff] %v1928_v18  ;;  %2330 = vst [vmem:[#allocation2 + $0x4c8] sm:$0xff] %v1575_v6 }
 0x265   :  { %v1932_v19 = vpop.f32.mrf.mxu0  ;;  %v1579_v21 = vpop.f32.mrf.mxu1 }
 0x266   :  { %2271 = vst [vmem:[#allocation2 + $0x2f0] sm:$0xff] %v1932_v19  ;;  %2333 = vst [vmem:[#allocation2 + $0x4e0] sm:$0xff] %v1579_v21 }
 0x267   :  { %v1934_v22 = vpop.f32.mrf.mxu0  ;;  %v1581_v12 = vpop.f32.mrf.mxu1 }
 0x268   :  { %2272 = vst [vmem:[#allocation2 + $0x2f8] sm:$0xff] %v1934_v22  ;;  %2334 = vst [vmem:[#allocation2 + $0x4e8] sm:$0xff] %v1581_v12 }
 0x269   :  { %v1938_v23 = vpop.f32.mrf.mxu0  ;;  %v1585_v25 = vpop.f32.mrf.mxu1 }
 0x26a   :  { %2275 = vst [vmem:[#allocation2 + $0x310] sm:$0xff] %v1938_v23  ;;  %2337 = vst [vmem:[#allocation2 + $0x500] sm:$0xff] %v1585_v25 }
 0x26b   :  { %v1940_v26 = vpop.f32.mrf.mxu0  ;;  %v1587_v16 = vpop.f32.mrf.mxu1 }
 0x26c   :  { %2276 = vst [vmem:[#allocation2 + $0x318] sm:$0xff] %v1940_v26  ;;  %2338 = vst [vmem:[#allocation2 + $0x508] sm:$0xff] %v1587_v16 }
 0x26d   :  { %v1944_v27 = vpop.f32.mrf.mxu0  ;;  %v1591_v29 = vpop.f32.mrf.mxu1 }
 0x26e   :  { %2279 = vst [vmem:[#allocation2 + $0x330] sm:$0xff] %v1944_v27  ;;  %2341 = vst [vmem:[#allocation2 + $0x520] sm:$0xff] %v1591_v29 }
 0x26f   :  { %v1946_v30 = vpop.f32.mrf.mxu0  ;;  %v1593_v20 = vpop.f32.mrf.mxu1 }
 0x270   :  { %2280 = vst [vmem:[#allocation2 + $0x338] sm:$0xff] %v1946_v30  ;;  %2342 = vst [vmem:[#allocation2 + $0x528] sm:$0xff] %v1593_v20 }
 0x271   :  { %v1950_v31 = vpop.f32.mrf.mxu0  ;;  %v1597_v33 = vpop.f32.mrf.mxu1 }
 0x272   :  { %2283 = vst [vmem:[#allocation2 + $0x350] sm:$0xff] %v1950_v31  ;;  %2345 = vst [vmem:[#allocation2 + $0x540] sm:$0xff] %v1597_v33 }
 0x273   :  { %v1952_v34 = vpop.f32.mrf.mxu0  ;;  %v1599_v24 = vpop.f32.mrf.mxu1 }
 0x274   :  { %2284 = vst [vmem:[#allocation2 + $0x358] sm:$0xff] %v1952_v34  ;;  %2346 = vst [vmem:[#allocation2 + $0x548] sm:$0xff] %v1599_v24 }
 0x275   :  { %v1956_v35 = vpop.f32.mrf.mxu0  ;;  %v1603_v37 = vpop.f32.mrf.mxu1 }
 0x276   :  { %2287 = vst [vmem:[#allocation2 + $0x370] sm:$0xff] %v1956_v35  ;;  %2349 = vst [vmem:[#allocation2 + $0x560] sm:$0xff] %v1603_v37 }
 0x277   :  { %v1958_v38 = vpop.f32.mrf.mxu0  ;;  %v1605_v28 = vpop.f32.mrf.mxu1 }
 0x278   :  { %2288 = vst [vmem:[#allocation2 + $0x378] sm:$0xff] %v1958_v38  ;;  %2350 = vst [vmem:[#allocation2 + $0x568] sm:$0xff] %v1605_v28 }
 0x279   :  { %v1962_v39 = vpop.f32.mrf.mxu0  ;;  %v1609_v41 = vpop.f32.mrf.mxu1 }
 0x27a   :  { %2291 = vst [vmem:[#allocation2 + $0x390] sm:$0xff] %v1962_v39  ;;  %2353 = vst [vmem:[#allocation2 + $0x580] sm:$0xff] %v1609_v41 }
 0x27b   :  { %v1964_v42 = vpop.f32.mrf.mxu0  ;;  %v1611_v32 = vpop.f32.mrf.mxu1 }
 0x27c   :  { %2292 = vst [vmem:[#allocation2 + $0x398] sm:$0xff] %v1964_v42  ;;  %2354 = vst [vmem:[#allocation2 + $0x588] sm:$0xff] %v1611_v32 }
 0x27d   :  { %v1968_v43 = vpop.f32.mrf.mxu0  ;;  %v1615_v45 = vpop.f32.mrf.mxu1 }
 0x27e   :  { %2295 = vst [vmem:[#allocation2 + $0x3b0] sm:$0xff] %v1968_v43  ;;  %2357 = vst [vmem:[#allocation2 + $0x5a0] sm:$0xff] %v1615_v45 }
 0x27f   :  { %v1970_v47 = vpop.f32.mrf.mxu0  ;;  %v1617_v36 = vpop.f32.mrf.mxu1 }
 0x280   :  { %2296 = vst [vmem:[#allocation2 + $0x3b8] sm:$0xff] %v1970_v47  ;;  %2358 = vst [vmem:[#allocation2 + $0x5a8] sm:$0xff] %v1617_v36 }
 0x281   :  { %v1974_v46 = vpop.f32.mrf.mxu0  ;;  %v1621_v51 = vpop.f32.mrf.mxu1 }
 0x282   :  { %2299 = vst [vmem:[#allocation2 + $0x3d0] sm:$0xff] %v1974_v46  ;;  %2361 = vst [vmem:[#allocation2 + $0x5c0] sm:$0xff] %v1621_v51 }
 0x283   :  { %v1976_v53 = vpop.f32.mrf.mxu0  ;;  %v1623_v40 = vpop.f32.mrf.mxu1 }
 0x284   :  { %2300 = vst [vmem:[#allocation2 + $0x3d8] sm:$0xff] %v1976_v53  ;;  %2362 = vst [vmem:[#allocation2 + $0x5c8] sm:$0xff] %v1623_v40 }
 0x285   :  { %v1980_v9 = vpop.f32.mrf.mxu0  ;;  %v1627_v48 = vpop.f32.mrf.mxu1 }
 0x286   :  { %2303 = vst [vmem:[#allocation2 + $0x3f0] sm:$0xff] %v1980_v9  ;;  %2365 = vst [vmem:[#allocation2 + $0x5e0] sm:$0xff] %v1627_v48 }
 0x287   :  { %v1982_v56 = vpop.f32.mrf.mxu0  ;;  %v1629_v8 = vpop.f32.mrf.mxu1 }
 0x288   :  { %2304 = vst [vmem:[#allocation2 + $0x3f8] sm:$0xff] %v1982_v56  ;;  %2366 = vst [vmem:[#allocation2 + $0x5e8] sm:$0xff] %v1629_v8 }
 0x289   :  { %v1986_v44 = vpop.f32.mrf.mxu0  ;;  %v1633_v50 = vpop.f32.mrf.mxu1 }
 0x28a   :  { %2307 = vst [vmem:[#allocation2 + $0x410] sm:$0xff] %v1986_v44  ;;  %2369 = vst [vmem:[#allocation2 + $0x600] sm:$0xff] %v1633_v50 }
 0x28b   :  { %v1988_v55 = vpop.f32.mrf.mxu0  ;;  %v1635_v57 = vpop.f32.mrf.mxu1 }
 0x28c   :  { %2308 = vst [vmem:[#allocation2 + $0x418] sm:$0xff] %v1988_v55  ;;  %2370 = vst [vmem:[#allocation2 + $0x608] sm:$0xff] %v1635_v57 }
 0x28d   :  { %v1992_v59 = vpop.f32.mrf.mxu0  ;;  %v1639_v60 = vpop.f32.mrf.mxu1 }
 0x28e   :  { %2311 = vst [vmem:[#allocation2 + $0x430] sm:$0xff] %v1992_v59  ;;  %2373 = vst [vmem:[#allocation2 + $0x620] sm:$0xff] %v1639_v60 }
 0x28f   :  { %v1994_v49 = vpop.f32.mrf.mxu0  ;;  %v1641_v52 = vpop.f32.mrf.mxu1 }
 0x290   :  { %2312 = vst [vmem:[#allocation2 + $0x438] sm:$0xff] %v1994_v49  ;;  %2374 = vst [vmem:[#allocation2 + $0x628] sm:$0xff] %v1641_v52 }
 0x291   :  { %v1998_v61 = vpop.f32.mrf.mxu0  ;;  %v1645_v63 = vpop.f32.mrf.mxu1 }
 0x292   :  { %2315 = vst [vmem:[#allocation2 + $0x450] sm:$0xff] %v1998_v61  ;;  %2377 = vst [vmem:[#allocation2 + $0x640] sm:$0xff] %v1645_v63 }
 0x293   :  { %v2000_v0 = vpop.f32.mrf.mxu0  ;;  %v1647_v54 = vpop.f32.mrf.mxu1 }
 0x294   :  { %2316 = vst [vmem:[#allocation2 + $0x458] sm:$0xff] %v2000_v0  ;;  %2378 = vst [vmem:[#allocation2 + $0x648] sm:$0xff] %v1647_v54 }
 0x295   :  { %v2004_v1 = vpop.f32.mrf.mxu0  ;;  %v1651_v3 = vpop.f32.mrf.mxu1 }
 0x296   :  { %2319 = vst [vmem:[#allocation2 + $0x470] sm:$0xff] %v2004_v1  ;;  %2381 = vst [vmem:[#allocation2 + $0x660] sm:$0xff] %v1651_v3 }
 0x297   :  { %v2006_v4 = vpop.f32.mrf.mxu0  ;;  %v1653_v58 = vpop.f32.mrf.mxu1 }
 0x298   :  { %2320 = vst [vmem:[#allocation2 + $0x478] sm:$0xff] %v2006_v4  ;;  %2382 = vst [vmem:[#allocation2 + $0x668] sm:$0xff] %v1653_v58 }
 0x299   :  { %v2010_v5 = vpop.f32.mrf.mxu0  ;;  %v1657_v7 = vpop.f32.mrf.mxu1 }
 0x29a   :  { %2323 = vst [vmem:[#allocation2 + $0x490] sm:$0xff] %v2010_v5  ;;  %2385 = vst [vmem:[#allocation2 + $0x680] sm:$0xff] %v1657_v7 }
 0x29b   :  { %v2012_v10 = vpop.f32.mrf.mxu0  ;;  %v1659_v62 = vpop.f32.mrf.mxu1 }
 0x29c   :  { %2324 = vst [vmem:[#allocation2 + $0x498] sm:$0xff] %v2012_v10  ;;  %2386 = vst [vmem:[#allocation2 + $0x688] sm:$0xff] %v1659_v62 }
 0x29d   :  { %v2016_v11 = vpop.f32.mrf.mxu0  ;;  %v1663_v13 = vpop.f32.mrf.mxu1 }
 0x29e   :  { %2327 = vst [vmem:[#allocation2 + $0x4b0] sm:$0xff] %v2016_v11  ;;  %2389 = vst [vmem:[#allocation2 + $0x6a0] sm:$0xff] %v1663_v13 }
 0x29f   :  { %v2018_v14 = vpop.f32.mrf.mxu0  ;;  %v1665_v2 = vpop.f32.mrf.mxu1 }
 0x2a0   :  { %2328 = vst [vmem:[#allocation2 + $0x4b8] sm:$0xff] %v2018_v14  ;;  %2390 = vst [vmem:[#allocation2 + $0x6a8] sm:$0xff] %v1665_v2 }
 0x2a1   :  { %v2022_v15 = vpop.f32.mrf.mxu0  ;;  %v1669_v17 = vpop.f32.mrf.mxu1 }
 0x2a2   :  { %2331 = vst [vmem:[#allocation2 + $0x4d0] sm:$0xff] %v2022_v15  ;;  %2393 = vst [vmem:[#allocation2 + $0x6c0] sm:$0xff] %v1669_v17 }
 0x2a3   :  { %v2024_v18 = vpop.f32.mrf.mxu0  ;;  %v1671_v6 = vpop.f32.mrf.mxu1 }
 0x2a4   :  { %2332 = vst [vmem:[#allocation2 + $0x4d8] sm:$0xff] %v2024_v18  ;;  %2394 = vst [vmem:[#allocation2 + $0x6c8] sm:$0xff] %v1671_v6 }
 0x2a5   :  { %v2028_v19 = vpop.f32.mrf.mxu0  ;;  %v1675_v21 = vpop.f32.mrf.mxu1 }
 0x2a6   :  { %2335 = vst [vmem:[#allocation2 + $0x4f0] sm:$0xff] %v2028_v19  ;;  %2397 = vst [vmem:[#allocation2 + $0x6e0] sm:$0xff] %v1675_v21 }
 0x2a7   :  { %v2030_v22 = vpop.f32.mrf.mxu0  ;;  %v1677_v12 = vpop.f32.mrf.mxu1 }
 0x2a8   :  { %2336 = vst [vmem:[#allocation2 + $0x4f8] sm:$0xff] %v2030_v22  ;;  %2398 = vst [vmem:[#allocation2 + $0x6e8] sm:$0xff] %v1677_v12 }
 0x2a9   :  { %v2034_v23 = vpop.f32.mrf.mxu0  ;;  %v1681_v25 = vpop.f32.mrf.mxu1 }
 0x2aa   :  { %2339 = vst [vmem:[#allocation2 + $0x510] sm:$0xff] %v2034_v23  ;;  %2401 = vst [vmem:[#allocation2 + $0x700] sm:$0xff] %v1681_v25 }
 0x2ab   :  { %v2036_v26 = vpop.f32.mrf.mxu0  ;;  %v1683_v16 = vpop.f32.mrf.mxu1 }
 0x2ac   :  { %2340 = vst [vmem:[#allocation2 + $0x518] sm:$0xff] %v2036_v26  ;;  %2402 = vst [vmem:[#allocation2 + $0x708] sm:$0xff] %v1683_v16 }
 0x2ad   :  { %v2040_v27 = vpop.f32.mrf.mxu0  ;;  %v1687_v29 = vpop.f32.mrf.mxu1 }
 0x2ae   :  { %2343 = vst [vmem:[#allocation2 + $0x530] sm:$0xff] %v2040_v27  ;;  %2405 = vst [vmem:[#allocation2 + $0x720] sm:$0xff] %v1687_v29 }
 0x2af   :  { %v2042_v30 = vpop.f32.mrf.mxu0  ;;  %v1689_v20 = vpop.f32.mrf.mxu1 }
 0x2b0   :  { %2344 = vst [vmem:[#allocation2 + $0x538] sm:$0xff] %v2042_v30  ;;  %2406 = vst [vmem:[#allocation2 + $0x728] sm:$0xff] %v1689_v20 }
 0x2b1   :  { %v2046_v31 = vpop.f32.mrf.mxu0  ;;  %v1693_v33 = vpop.f32.mrf.mxu1 }
 0x2b2   :  { %2347 = vst [vmem:[#allocation2 + $0x550] sm:$0xff] %v2046_v31  ;;  %2409 = vst [vmem:[#allocation2 + $0x740] sm:$0xff] %v1693_v33 }
 0x2b3   :  { %v2048_v34 = vpop.f32.mrf.mxu0  ;;  %v1695_v24 = vpop.f32.mrf.mxu1 }
 0x2b4   :  { %2348 = vst [vmem:[#allocation2 + $0x558] sm:$0xff] %v2048_v34  ;;  %2410 = vst [vmem:[#allocation2 + $0x748] sm:$0xff] %v1695_v24 }
 0x2b5   :  { %v2052_v35 = vpop.f32.mrf.mxu0  ;;  %v1699_v37 = vpop.f32.mrf.mxu1 }
 0x2b6   :  { %2351 = vst [vmem:[#allocation2 + $0x570] sm:$0xff] %v2052_v35  ;;  %2413 = vst [vmem:[#allocation2 + $0x760] sm:$0xff] %v1699_v37 }
 0x2b7   :  { %v2054_v38 = vpop.f32.mrf.mxu0  ;;  %v1701_v28 = vpop.f32.mrf.mxu1 }
 0x2b8   :  { %2352 = vst [vmem:[#allocation2 + $0x578] sm:$0xff] %v2054_v38  ;;  %2414 = vst [vmem:[#allocation2 + $0x768] sm:$0xff] %v1701_v28 }
 0x2b9   :  { %v2058_v39 = vpop.f32.mrf.mxu0  ;;  %v1705_v41 = vpop.f32.mrf.mxu1 }
 0x2ba   :  { %2355 = vst [vmem:[#allocation2 + $0x590] sm:$0xff] %v2058_v39  ;;  %2417 = vst [vmem:[#allocation2 + $0x780] sm:$0xff] %v1705_v41 }
 0x2bb   :  { %v2060_v42 = vpop.f32.mrf.mxu0  ;;  %v1707_v32 = vpop.f32.mrf.mxu1 }
 0x2bc   :  { %2356 = vst [vmem:[#allocation2 + $0x598] sm:$0xff] %v2060_v42  ;;  %2418 = vst [vmem:[#allocation2 + $0x788] sm:$0xff] %v1707_v32 }
 0x2bd   :  { %v2064_v43 = vpop.f32.mrf.mxu0  ;;  %v1711_v45 = vpop.f32.mrf.mxu1 }
 0x2be   :  { %2359 = vst [vmem:[#allocation2 + $0x5b0] sm:$0xff] %v2064_v43  ;;  %2421 = vst [vmem:[#allocation2 + $0x7a0] sm:$0xff] %v1711_v45 }
 0x2bf   :  { %v2066_v47 = vpop.f32.mrf.mxu0  ;;  %v1713_v36 = vpop.f32.mrf.mxu1 }
 0x2c0   :  { %2360 = vst [vmem:[#allocation2 + $0x5b8] sm:$0xff] %v2066_v47  ;;  %2422 = vst [vmem:[#allocation2 + $0x7a8] sm:$0xff] %v1713_v36 }
 0x2c1   :  { %v2070_v46 = vpop.f32.mrf.mxu0  ;;  %v1717_v51 = vpop.f32.mrf.mxu1 }
 0x2c2   :  { %2363 = vst [vmem:[#allocation2 + $0x5d0] sm:$0xff] %v2070_v46  ;;  %2425 = vst [vmem:[#allocation2 + $0x7c0] sm:$0xff] %v1717_v51 }
 0x2c3   :  { %v2072_v53 = vpop.f32.mrf.mxu0  ;;  %v1719_v40 = vpop.f32.mrf.mxu1 }
 0x2c4   :  { %2364 = vst [vmem:[#allocation2 + $0x5d8] sm:$0xff] %v2072_v53  ;;  %2426 = vst [vmem:[#allocation2 + $0x7c8] sm:$0xff] %v1719_v40 }
 0x2c5   :  { %v2076_v9 = vpop.f32.mrf.mxu0  ;;  %v1723_v48 = vpop.f32.mrf.mxu1 }
 0x2c6   :  { %2367 = vst [vmem:[#allocation2 + $0x5f0] sm:$0xff] %v2076_v9  ;;  %2429 = vst [vmem:[#allocation2 + $0x7e0] sm:$0xff] %v1723_v48 }
 0x2c7   :  { %v2078_v56 = vpop.f32.mrf.mxu0  ;;  %v1725_v8 = vpop.f32.mrf.mxu1 }
 0x2c8   :  { %2368 = vst [vmem:[#allocation2 + $0x5f8] sm:$0xff] %v2078_v56  ;;  %2430 = vst [vmem:[#allocation2 + $0x7e8] sm:$0xff] %v1725_v8 }
 0x2c9   :  { %v2082_v44 = vpop.f32.mrf.mxu0 }
 0x2ca   :  { %2371 = vst [vmem:[#allocation2 + $0x610] sm:$0xff] %v2082_v44 }
 0x2cb   :  { %v2084_v50 = vpop.f32.mrf.mxu0 }
 0x2cc   :  { %2372 = vst [vmem:[#allocation2 + $0x618] sm:$0xff] %v2084_v50 }
 0x2cd   :  { %v2088_v55 = vpop.f32.mrf.mxu0 }
 0x2ce   :  { %2375 = vst [vmem:[#allocation2 + $0x630] sm:$0xff] %v2088_v55 }
 0x2cf   :  { %v2090_v57 = vpop.f32.mrf.mxu0 }
 0x2d0   :  { %2376 = vst [vmem:[#allocation2 + $0x638] sm:$0xff] %v2090_v57 }
 0x2d1   :  { %v2094_v59 = vpop.f32.mrf.mxu0 }
 0x2d2   :  { %2379 = vst [vmem:[#allocation2 + $0x650] sm:$0xff] %v2094_v59 }
 0x2d3   :  { %v2096_v60 = vpop.f32.mrf.mxu0 }
 0x2d4   :  { %2380 = vst [vmem:[#allocation2 + $0x658] sm:$0xff] %v2096_v60 }
 0x2d5   :  { %v2100_v49 = vpop.f32.mrf.mxu0 }
 0x2d6   :  { %2383 = vst [vmem:[#allocation2 + $0x670] sm:$0xff] %v2100_v49 }
 0x2d7   :  { %v2102_v52 = vpop.f32.mrf.mxu0 }
 0x2d8   :  { %2384 = vst [vmem:[#allocation2 + $0x678] sm:$0xff] %v2102_v52 }
 0x2d9   :  { %v2106_v61 = vpop.f32.mrf.mxu0 }
 0x2da   :  { %2387 = vst [vmem:[#allocation2 + $0x690] sm:$0xff] %v2106_v61 }
 0x2db   :  { %v2108_v63 = vpop.f32.mrf.mxu0 }
 0x2dc   :  { %2388 = vst [vmem:[#allocation2 + $0x698] sm:$0xff] %v2108_v63 }
 0x2dd   :  { %v2112_v0 = vpop.f32.mrf.mxu0 }
 0x2de   :  { %2391 = vst [vmem:[#allocation2 + $0x6b0] sm:$0xff] %v2112_v0 }
 0x2df   :  { %v2114_v54 = vpop.f32.mrf.mxu0 }
 0x2e0   :  { %2392 = vst [vmem:[#allocation2 + $0x6b8] sm:$0xff] %v2114_v54 }
 0x2e1   :  { %v2118_v1 = vpop.f32.mrf.mxu0 }
 0x2e2   :  { %2395 = vst [vmem:[#allocation2 + $0x6d0] sm:$0xff] %v2118_v1 }
 0x2e3   :  { %v2120_v3 = vpop.f32.mrf.mxu0 }
 0x2e4   :  { %2396 = vst [vmem:[#allocation2 + $0x6d8] sm:$0xff] %v2120_v3 }
 0x2e5   :  { %v2124_v4 = vpop.f32.mrf.mxu0 }
 0x2e6   :  { %2399 = vst [vmem:[#allocation2 + $0x6f0] sm:$0xff] %v2124_v4 }
 0x2e7   :  { %v2126_v58 = vpop.f32.mrf.mxu0 }
 0x2e8   :  { %2400 = vst [vmem:[#allocation2 + $0x6f8] sm:$0xff] %v2126_v58 }
 0x2e9   :  { %v2130_v5 = vpop.f32.mrf.mxu0 }
 0x2ea   :  { %2403 = vst [vmem:[#allocation2 + $0x710] sm:$0xff] %v2130_v5 }
 0x2eb   :  { %v2132_v7 = vpop.f32.mrf.mxu0 }
 0x2ec   :  { %2404 = vst [vmem:[#allocation2 + $0x718] sm:$0xff] %v2132_v7 }
 0x2ed   :  { %v2136_v10 = vpop.f32.mrf.mxu0 }
 0x2ee   :  { %2407 = vst [vmem:[#allocation2 + $0x730] sm:$0xff] %v2136_v10 }
 0x2ef   :  { %v2138_v62 = vpop.f32.mrf.mxu0 }
 0x2f0   :  { %2408 = vst [vmem:[#allocation2 + $0x738] sm:$0xff] %v2138_v62 }
 0x2f1   :  { %v2142_v11 = vpop.f32.mrf.mxu0 }
 0x2f2   :  { %2411 = vst [vmem:[#allocation2 + $0x750] sm:$0xff] %v2142_v11 }
 0x2f3   :  { %v2144_v13 = vpop.f32.mrf.mxu0 }
 0x2f4   :  { %2412 = vst [vmem:[#allocation2 + $0x758] sm:$0xff] %v2144_v13 }
 0x2f5   :  { %v2148_v14 = vpop.f32.mrf.mxu0 }
 0x2f6   :  { %2415 = vst [vmem:[#allocation2 + $0x770] sm:$0xff] %v2148_v14 }
 0x2f7   :  { %v2150_v2 = vpop.f32.mrf.mxu0 }
 0x2f8   :  { %2416 = vst [vmem:[#allocation2 + $0x778] sm:$0xff] %v2150_v2 }
 0x2f9   :  { %v2154_v15 = vpop.f32.mrf.mxu0 }
 0x2fa   :  { %2419 = vst [vmem:[#allocation2 + $0x790] sm:$0xff] %v2154_v15 }
 0x2fb   :  { %v2156_v17 = vpop.f32.mrf.mxu0 }
 0x2fc   :  { %2420 = vst [vmem:[#allocation2 + $0x798] sm:$0xff] %v2156_v17 }
 0x2fd   :  { %v2160_v18 = vpop.f32.mrf.mxu0 }
 0x2fe   :  { %2423 = vst [vmem:[#allocation2 + $0x7b0] sm:$0xff] %v2160_v18 }
 0x2ff   :  { %v2162_v6 = vpop.f32.mrf.mxu0 }
 0x300   :  { %2424 = vst [vmem:[#allocation2 + $0x7b8] sm:$0xff] %v2162_v6 }
 0x301   :  { %v2166_v19 = vpop.f32.mrf.mxu0 }
 0x302   :  { %2427 = vst [vmem:[#allocation2 + $0x7d0] sm:$0xff] %v2166_v19 }
 0x303   :  { %v2168_v21 = vpop.f32.mrf.mxu0 }
 0x304   :  { %2428 = vst [vmem:[#allocation2 + $0x7d8] sm:$0xff] %v2168_v21 }
 0x305   :  { %v2172_v22 = vpop.f32.mrf.mxu0 }
 0x306   :  { %2431 = vst [vmem:[#allocation2 + $0x7f0] sm:$0xff] %v2172_v22 }
 0x307   :  { %v2174_v12 = vpop.f32.mrf.mxu0 }
 0x308   :  { %2432 = vst [vmem:[#allocation2 + $0x7f8] sm:$0xff] %v2174_v12 }
 0x309   :  { %2957 = shalt.err (!%p2954_p4)
}
 0x30a   :  { %s2971_s17 = smov 512   ;;  %s2972_s4 = smov 32  }
 0x30b   :  { %2444 = dma.vmem_to_hbm [thread:$0]  %s2439_s3, 32768, %s4137_s6, [#allocation3], %s2971_s17, %s2971_s17, %s2972_s4  }
 0x30c   :  { %2966 = dma.done.wait [#allocation3], 32768  }
 0x30d   :  { %2967 = vsyncadd [#allocation3], 4294934528 }
 0x30e   :  { %2448 = vsyncpa [#allocation3], 1 }

</bundles_post_ra>
